<compile_context>
chip_gen: v7x
topology: tpu7x:2x2x1
jax: 0.10.0
libtpu: 0.0.40
codegen_flags: <defaults>
</compile_context>

<pallas_src>
import math
import jax
import jax.numpy as jnp
from jax.experimental import pallas as pl
from jax.experimental.pallas import tpu as pltpu

NUM_CLASSES = 10
LANES = 128

# Small, module-consistent stand-in shapes (real xception head: in_dim=2048,
# hidden=1000 -> padded 1024).
B = 512          # demo batch: several tiles per call amortize the one-shot weight DMA
IN_DIM = 512     # stands in for model.last_linear.in_features (2048)
HIDDEN = 250     # stands in for the 1000-unit hidden layer (lane-padded to 256 below)
N_PAD = LANES    # lane-dense padded classifier width (sliced back to NUM_CLASSES)


def _round_up(x, m):
    return (x + m - 1) // m * m


def _chip_defaults():
    """Pick batch tile / TensorCore count from the attached chip generation."""
    kind = jax.devices()[0].device_kind.lower()
    # v6e/v7x MXU is 2x256x256 -> M=256 fills the systolic M dim and halves the
    # grid step count; v2..v5 use 128x128 MXU tiles, M=128 already saturates
    # them and a bigger tile only adds VMEM pressure.
    tm = 128 if any(g in kind for g in ("v2", "v3", "v4", "v5")) else 256
    tensorcores = 2 if "v7" in kind else 1
    return tm, tensorcores


def _head_kernel(feat_ref, w1_ref, b1_ref, w2_ref, b2_ref, out_ref):
    # Dropout (eval: identity) -> Linear -> ReLU(inplace) -> Dropout -> Linear
    x = feat_ref[...]                                                  # [tm, K] bf16
    h = jnp.dot(x, w1_ref[...], preferred_element_type=jnp.float32)    # f32 MXU accum
    h = jnp.maximum(h + b1_ref[...], 0.0)                              # bias + ReLU
    h = h.astype(jnp.bfloat16)                                         # back to MXU dtype
    o = jnp.dot(h, w2_ref[...], preferred_element_type=jnp.float32)    # [tm, N_PAD]
    out_ref[...] = (o + b2_ref[...]).astype(out_ref.dtype)


def classifier_head(feat, w1, b1, w2, b2, *, num_classes=NUM_CLASSES,
                    tm=None, out_dtype=jnp.bfloat16):
    """Fused MLP head.

    feat: [B, in_dim] bf16, w1: [in_dim, hidden_pad] bf16, b1: [1, hidden_pad] f32,
    w2: [hidden_pad, n_pad] bf16 (zero-padded past num_classes), b2: [1, n_pad] f32.
    hidden_pad and n_pad must be multiples of 128 lanes.
    Returns [B, num_classes] f32 logits.
    """
    b, in_dim = feat.shape
    hidden = w1.shape[1]
    n_pad = w2.shape[1]
    assert hidden % LANES == 0 and n_pad % LANES == 0, "pad hidden/out to 128 lanes"

    default_tm, n_tc = _chip_defaults()
    if tm is None:
        tm = default_tm
    tm = min(tm, _round_up(b, 8))          # keep the tile (8,128)-legal for tiny batches

    # Ragged batches (b % tm != 0) are handled by Pallas boundary masking on the
    # partial block -- no jnp.pad materialization / extra HBM pass over feat.
    grid = (pl.cdiv(b, tm),)

    # Megacore choice (only v7x has 2 TCs): "parallel" batch sharding DMAs the
    # resident weights into *both* TCs' VMEM, so only shard the batch when the
    # per-TC feat+out stream outweighs the duplicated weight bytes.
    out_itemsize = jnp.dtype(out_dtype).itemsize
    weight_bytes = w1.size * w1.dtype.itemsize + w2.size * w2.dtype.itemsize
    stream_bytes_per_row = in_dim * feat.dtype.itemsize + n_pad * out_itemsize
    if n_tc > 1 and (b // n_tc) * stream_bytes_per_row < weight_bytes:
        semantics = ("arbitrary",)
    else:
        semantics = ("parallel",)

    # Explicit VMEM budget: single-buffered weights + f32 biases +
    # double-buffered feat/out tiles, with 2x headroom, floored at the 16 MiB
    # default scoped limit (avoids surprises at real xception shapes on v5e).
    vmem_bytes = (
        weight_bytes                                  # W1/W2, Buffered(1)
        + (hidden + n_pad) * 4                        # f32 biases
        + 2 * tm * in_dim * feat.dtype.itemsize       # double-buffered feat tile
        + 2 * tm * n_pad * out_itemsize)              # double-buffered out tile
    vmem_limit = int(min(max(2 * vmem_bytes, 16 * 2**20), 64 * 2**20))

    def _resident(block_shape):
        # Constant index_map => fetched once, VMEM-resident across all batch
        # tiles; Buffered(1) drops the default double buffer for these blocks.
        return pl.BlockSpec(block_shape, lambda i: (0, 0),
                            pipeline_mode=pl.Buffered(1))

    out = pl.pallas_call(
        _head_kernel,
        out_shape=jax.ShapeDtypeStruct((b, n_pad), out_dtype),
        grid=grid,
        in_specs=[
            pl.BlockSpec((tm, in_dim), lambda i: (i, 0)),   # feat streams per tile
            _resident((in_dim, hidden)),                    # W1
            _resident((1, hidden)),                         # b1
            _resident((hidden, n_pad)),                     # W2
            _resident((1, n_pad)),                          # b2
        ],
        out_specs=pl.BlockSpec((tm, n_pad), lambda i: (i, 0)),
        compiler_params=pltpu.CompilerParams(
            dimension_semantics=semantics,
            vmem_limit_bytes=vmem_limit),
    )(feat, w1, b1, w2, b2)

    # Slice the lane-padded classifier width back; return f32 logits like torch.
    return out[:, :num_classes].astype(jnp.float32)


def init_params(key, in_dim=IN_DIM, hidden=HIDDEN, num_classes=NUM_CLASSES):
    """nn.Linear default init U(-1/sqrt(fan_in), +), then lane padding.

    Real checkpoints load the same way: W1 [in_dim, 1000] / W2 [1000, 10] are
    zero-padded to hidden 1024 / 128 output lanes so both MXU passes stay
    dense (padded hidden units see ReLU(0)=0 and hit zero W2 rows -> exact
    no-op). Weights bf16 (halves weight-HBM traffic, native MXU dtype);
    biases stay f32 row vectors (PyTorch stores them 1-D -- reshape on load).
    """
    k1, k2, k3, k4 = jax.random.split(key, 4)
    lim1 = 1.0 / math.sqrt(in_dim)
    lim2 = 1.0 / math.sqrt(hidden)
    w1 = jax.random.uniform(k1, (in_dim, hidden), jnp.float32, -lim1, lim1)
    b1 = jax.random.uniform(k2, (1, hidden), jnp.float32, -lim1, lim1)
    w2 = jax.random.uniform(k3, (hidden, num_classes), jnp.float32, -lim2, lim2)
    b2 = jax.random.uniform(k4, (1, num_classes), jnp.float32, -lim2, lim2)

    hidden_pad = _round_up(hidden, LANES)
    n_pad = _round_up(max(num_classes, LANES), LANES)
    w1_p = jnp.zeros((in_dim, hidden_pad), jnp.float32).at[:, :hidden].set(w1)
    b1_p = jnp.zeros((1, hidden_pad), jnp.float32).at[:, :hidden].set(b1)
    w2_p = jnp.zeros((hidden_pad, n_pad), jnp.float32).at[:hidden, :num_classes].set(w2)
    b2_p = jnp.zeros((1, n_pad), jnp.float32).at[:, :num_classes].set(b2)
    return w1_p.astype(jnp.bfloat16), b1_p, w2_p.astype(jnp.bfloat16), b2_p


def _reference(feat, w1, b1, w2, b2, num_classes):
    """Plain-JAX reference on the same bf16-rounded weights, f32 accumulation."""
    f32 = jnp.float32
    h = jnp.maximum(feat.astype(f32) @ w1.astype(f32) + b1, 0.0)
    h = h.astype(jnp.bfloat16).astype(f32)        # kernel recasts hidden to bf16
    o = h @ w2.astype(f32) + b2
    return o[:, :num_classes]


if __name__ == "__main__":
    key = jax.random.PRNGKey(0)
    k_feat, k_feat2, k_params = jax.random.split(key, 3)

    w1, b1, w2, b2 = init_params(k_params)

    # Pooled Xception features (stand-in for the frozen backbone's x.view(B, -1)).
    feat = jax.random.normal(k_feat, (B, IN_DIM), jnp.float32).astype(jnp.bfloat16)
    out = jax.block_until_ready(classifier_head(feat, w1, b1, w2, b2))
    assert out.shape == (B, NUM_CLASSES)
    ref = _reference(feat, w1, b1, w2, b2, NUM_CLASSES)
    assert jnp.allclose(out, ref, atol=2e-2, rtol=2e-2)

    # Ragged batch (200 % 128 != 0): Pallas masks the partial boundary block;
    # no jnp.pad round-trip of the feature matrix through HBM.
    feat2 = jax.random.normal(k_feat2, (200, IN_DIM), jnp.float32).astype(jnp.bfloat16)
    out2 = jax.block_until_ready(classifier_head(feat2, w1, b1, w2, b2, tm=128))
    assert out2.shape == (200, NUM_CLASSES)
    ref2 = _reference(feat2, w1, b1, w2, b2, NUM_CLASSES)
    assert jnp.allclose(out2, ref2, atol=2e-2, rtol=2e-2)

    print("KERNEL_OK")
</pallas_src>

<mosaic_0001>
module attributes {stable_mosaic.version = 11 : i64} {
  func.func @_head_kernel(%arg0: i32, %arg1: memref<256x512xbf16, #tpu.memory_space<vmem>>, %arg2: memref<512x256xbf16, #tpu.memory_space<vmem>>, %arg3: memref<1x256xf32, #tpu.memory_space<vmem>>, %arg4: memref<256x128xbf16, #tpu.memory_space<vmem>>, %arg5: memref<1x128xf32, #tpu.memory_space<vmem>>, %arg6: memref<256x128xbf16, #tpu.memory_space<vmem>>) attributes {dimension_semantics = [#tpu.dimension_semantics<parallel>], iteration_bounds = array<i64: 2>, scalar_prefetch = 0 : i64, scratch_operands = 0 : i64, tpu.core_type = #tpu.core_type<tc>, window_params = [{transform_indices = @transform_0, window_bounds = array<i64: 256, 512>}, {pipeline_mode = #tpu.pipeline_mode<synchronous>, transform_indices = @transform_1, window_bounds = array<i64: 512, 256>}, {pipeline_mode = #tpu.pipeline_mode<synchronous>, transform_indices = @transform_2, window_bounds = array<i64: 1, 256>}, {pipeline_mode = #tpu.pipeline_mode<synchronous>, transform_indices = @transform_3, window_bounds = array<i64: 256, 128>}, {pipeline_mode = #tpu.pipeline_mode<synchronous>, transform_indices = @transform_4, window_bounds = array<i64: 1, 128>}, {transform_indices = @transform_5, window_bounds = array<i64: 256, 128>}]} {
    %c0 = arith.constant 0 : index
    %c0_0 = arith.constant 0 : index
    %0 = vector.load %arg1[%c0, %c0_0] : memref<256x512xbf16, #tpu.memory_space<vmem>>, vector<256x512xbf16>
    %c0_1 = arith.constant 0 : index
    %c0_2 = arith.constant 0 : index
    %1 = vector.load %arg2[%c0_1, %c0_2] : memref<512x256xbf16, #tpu.memory_space<vmem>>, vector<512x256xbf16>
    %cst = arith.constant dense<0.000000e+00> : vector<256x256xf32>
    %2 = tpu.matmul %0, %1, %cst {dimension_numbers = #tpu.dot_dimension_numbers<[1], [0], [0], [1], [0, 0, 1, 1], [], []>} : vector<256x512xbf16>, vector<512x256xbf16>, vector<256x256xf32> -> vector<256x256xf32>
    %c0_3 = arith.constant 0 : index
    %c0_4 = arith.constant 0 : index
    %3 = vector.load %arg3[%c0_3, %c0_4] : memref<1x256xf32, #tpu.memory_space<vmem>>, vector<1x256xf32>
    %4 = vector.broadcast %3 : vector<1x256xf32> to vector<256x256xf32>
    %5 = arith.addf %2, %4 : vector<256x256xf32>
    %cst_5 = arith.constant 0.000000e+00 : f32
    %6 = vector.broadcast %cst_5 : f32 to vector<256x256xf32>
    %7 = arith.maximumf %5, %6 : vector<256x256xf32>
    %8 = arith.truncf %7 : vector<256x256xf32> to vector<256x256xbf16>
    %c0_6 = arith.constant 0 : index
    %c0_7 = arith.constant 0 : index
    %9 = vector.load %arg4[%c0_6, %c0_7] : memref<256x128xbf16, #tpu.memory_space<vmem>>, vector<256x128xbf16>
    %cst_8 = arith.constant dense<0.000000e+00> : vector<256x128xf32>
    %10 = tpu.matmul %8, %9, %cst_8 {dimension_numbers = #tpu.dot_dimension_numbers<[1], [0], [0], [1], [0, 0, 1, 1], [], []>} : vector<256x256xbf16>, vector<256x128xbf16>, vector<256x128xf32> -> vector<256x128xf32>
    %c0_9 = arith.constant 0 : index
    %c0_10 = arith.constant 0 : index
    %11 = vector.load %arg5[%c0_9, %c0_10] : memref<1x128xf32, #tpu.memory_space<vmem>>, vector<1x128xf32>
    %12 = vector.broadcast %11 : vector<1x128xf32> to vector<256x128xf32>
    %13 = arith.addf %10, %12 : vector<256x128xf32>
    %14 = arith.truncf %13 : vector<256x128xf32> to vector<256x128xbf16>
    %c0_11 = arith.constant 0 : index
    %c0_12 = arith.constant 0 : index
    %15 = vector.load %arg6[%c0_11, %c0_12] : memref<256x128xbf16, #tpu.memory_space<vmem>>, vector<256x128xbf16>
    tpu.vector_store %arg6[%c0_11, %c0_12], %14 {strides = array<i32>} : memref<256x128xbf16, #tpu.memory_space<vmem>>, vector<256x128xbf16>,
    return
  }
  func.func @transform_0(%arg0: i32) -> (i32, i32) {
    %c0_i32 = arith.constant 0 : i32
    %c0_i32_0 = arith.constant 0 : i32
    return %arg0, %c0_i32 : i32, i32
  }
  func.func @transform_1(%arg0: i32) -> (i32, i32) {
    %c0_i32 = arith.constant 0 : i32
    %c0_i32_0 = arith.constant 0 : i32
    %c0_i32_1 = arith.constant 0 : i32
    return %c0_i32, %c0_i32_0 : i32, i32
  }
  func.func @transform_2(%arg0: i32) -> (i32, i32) {
    %c0_i32 = arith.constant 0 : i32
    %c0_i32_0 = arith.constant 0 : i32
    %c0_i32_1 = arith.constant 0 : i32
    return %c0_i32, %c0_i32_0 : i32, i32
  }
  func.func @transform_3(%arg0: i32) -> (i32, i32) {
    %c0_i32 = arith.constant 0 : i32
    %c0_i32_0 = arith.constant 0 : i32
    %c0_i32_1 = arith.constant 0 : i32
    return %c0_i32, %c0_i32_0 : i32, i32
  }
  func.func @transform_4(%arg0: i32) -> (i32, i32) {
    %c0_i32 = arith.constant 0 : i32
    %c0_i32_0 = arith.constant 0 : i32
    %c0_i32_1 = arith.constant 0 : i32
    return %c0_i32, %c0_i32_0 : i32, i32
  }
  func.func @transform_5(%arg0: i32) -> (i32, i32) {
    %c0_i32 = arith.constant 0 : i32
    %c0_i32_0 = arith.constant 0 : i32
    return %arg0, %c0_i32 : i32, i32
  }
}

</mosaic_0001>

<bundles_post_ra>
// kernel: tpu_custom_call.1
= control target key start
LH: loop header
LB: loop body
LE: loop exit
PB: predicated region body
PF: predicated region fallthrough
CT: control target
= control target key end

     0   :  { %10 = vsyncpa [#allocation3], 0  ;;  %s3705_s0 = inlined_call_operand.hbm [shape: bf16[512,512], index: 0, kind: input, shape index: {}]   ;;  %s3706_s1 = inlined_call_operand.hbm [shape: bf16[512,256], index: 1, kind: input, shape index: {}]   ;;  %s3707_s2 = inlined_call_operand.vmem [shape: f32[1,256], index: 2, kind: input, shape index: {}]   ;;  %s3708_s3 = inlined_call_operand.hbm [shape: bf16[256,128], index: 3, kind: input, shape index: {}]   ;;  %s3709_s4 = inlined_call_operand.vmem [shape: f32[1,128], index: 4, kind: input, shape index: {}]   ;;  %s3710_s5 = inlined_call_operand.hbm [shape: bf16[512,128], index: 5, kind: output, shape index: {}]  }
   0x1   :  { %12 = vsyncpa [#allocation3 + $0x1], 0 }
   0x2   :  { %13 = vsyncpa [#allocation6], 0 }
   0x3   :  { %14 = vsyncpa [#allocation4], 0 }
   0x4   :  { %16 = vsyncpa [#allocation4 + $0x1], 0  ;;  %s3181_s18 = smov 0   ;;  %s3183_s19 = smov 0  }
   0x5   :  { %s3185_s20 = smov 0   ;;  %s3187_s21 = smov 0  }
   0x6 LB: > { %s3202_s22 = sadd.s32 4294967295, %s3137_s21   ;;  %s2100_s23 = sadd.s32 4294967294, %s3137_s21   ;;  %s3137_s21 = sphi %s3187_s21, %s3730_s21   ;;  %s3133_s20 = sphi %s3185_s20, %s3729_s20   ;;  %s3129_s19 = sphi %s3183_s19, %s3728_s19   ;;  %s3125_s18 = sphi %s3181_s18, %s3727_s18  }
   0x7   : > { %p42_p0 = scmp.ne.s32.totalorder %s3129_s19, %s3125_s18  ;;  %p3711_p1 = scmp.eq.s32.totalorder %s3202_s22, 0 }
   0x8   : > { %p156_p3 = scmp.eq.s32.totalorder %s2100_s23, 1  ;;  %p2101_p5 = scmp.ge.s32.totalorder %s3137_s21, 1 }
   0x9   : > { %p3211_p4 = por %p3711_p1, %p42_p0  ;;  %p163_p7 = scmp.lt.s32.totalorder %s3137_s21, 3 }
   0xa   : > { %p3216_p6 = por %p156_p3, %p42_p0  ;;  %s3139_s27 = smov [#allocation5]  }
   0xb   : > { %s3714_s24 = scalar_select %p3211_p4, 1, 0 }
   0xc   : > { %s3715_s25 = scalar_select %p3216_p6, 1, 0 }
   0xd   : > { %p3221_p8 = pnand %p2101_p5, %p163_p7  ;;  %s175_s28 = sshll.u32 %s3139_s27, 4  ;;  %s3225_s28 = int_to_ptr.vmem [resolvable:$true] %s175_s28 }
   0xe   : > { %s3140_s30 = smov [#allocation7]   ;;  %s2981_s9 = scalar_lea.hbm %s3706_s1, 8192 }
   0xf   : > { %p2710_p9 = pneg %p3221_p8  ;;  %s191_s6 = sshll.u32 %s3140_s30, 4  ;;  %s3236_s6 = int_to_ptr.vmem [resolvable:$true] %s191_s6 }
  0x10   : > { %p2982_p12 = scmp.ne.s32.totalorder %s3706_s1, %s2981_s9  ;;  %p2988_p5 = scmp.lt.u32.totalorder %s2981_s9, %s3706_s1 }
  0x11   : > { %p3232_p11 = pnand %p2710_p9, %p3711_p1 }
  0x13   : > { %p2983_p13 = pneg %p3232_p11 }
  0x15   : > { %p2984_p0 = pnand %p2983_p13, %p2982_p12 }
  0x17   : > { %p2985_p3 = pneg %p2984_p0 }
  0x19   : > { %p2990_p7 = pnand %p2988_p5, %p2985_p3 }
  0x1b   : > { %2993 = shalt.err (!%p2990_p7)
}
  0x1c   : > { %s2994_s14 = scalar_lea.vmem %s3225_s28, 8192  ;;  %p3002_p2 = scmp.lt.s32.totalorder %s3225_s28, %s3225_s28 }
  0x1d   : > { %p2995_p9 = scmp.ne.s32.totalorder %s3225_s28, %s2994_s14  ;;  %p3003_p12 = scmp.lt.s32.totalorder %s2994_s14, %s2994_s14 }
  0x1f   : > { %p2997_p10 = pnand %p2995_p9, %p2983_p13  ;;  %p3004_p0 = por %p3003_p12, %p3002_p2 }
  0x21   : > { %p2998_p1 = pneg %p2997_p10 }
  0x23   : > { %p3005_p6 = pnand %p3004_p0, %p2998_p1 }
  0x25   : > { %3008 = shalt.err (!%p3005_p6)
}
  0x26   : > { %s3141_s15 = smov 128   ;;  %s3142_s16 = smov 8  }
  0x27   : > { %2713 = dma.hbm_to_vmem [thread:$0]  (!%p3232_p11), %s3706_s1, 8192, %s3225_s28, [#allocation6], %s3141_s15, %s3141_s15, %s3142_s16  }
  0x28   : > { %s3009_s7 = scalar_lea.hbm %s3708_s3, 2048 }
  0x29   : > { %p3010_p2 = scmp.ne.s32.totalorder %s3708_s3, %s3009_s7  ;;  %p3016_p10 = scmp.lt.u32.totalorder %s3009_s7, %s3708_s3 }
  0x2b   : > { %p3012_p1 = pnand %p3010_p2, %p2983_p13 }
  0x2d   : > { %p3013_p6 = pneg %p3012_p1 }
  0x2f   : > { %p3018_p3 = pnand %p3016_p10, %p3013_p6 }
  0x31   : > { %3021 = shalt.err (!%p3018_p3)
}
  0x32   : > { %s3022_s28 = scalar_lea.vmem %s3236_s6, 2048  ;;  %p3030_p12 = scmp.lt.s32.totalorder %s3236_s6, %s3236_s6 }
  0x33   : > { %p3023_p5 = scmp.ne.s32.totalorder %s3236_s6, %s3022_s28  ;;  %p3031_p0 = scmp.lt.s32.totalorder %s3022_s28, %s3022_s28 }
  0x35   : > { %p3025_p7 = pnand %p3023_p5, %p2983_p13  ;;  %p3032_p2 = por %p3031_p0, %p3030_p12 }
  0x37   : > { %p3026_p9 = pneg %p3025_p7 }
  0x39   : > { %p3033_p1 = pnand %p3032_p2, %p3026_p9 }
  0x3b   : > { %3036 = shalt.err (!%p3033_p1)
}
  0x3c   : > { %s3143_s12 = smov 64   ;;  %s3144_s13 = smov 4  }
  0x3d   : > { %2716 = dma.hbm_to_vmem [thread:$0]  (!%p3232_p11), %s3708_s3, 2048, %s3236_s6, [#allocation6], %s3143_s12, %s3143_s12, %s3144_s13  }
  0x3e   : > { %s3291_s16 = sadd.s32 1, %s3137_s21   ;;  %s29_s23 = sadd.s32 1, %s3133_s20 }
  0x3f   : > { %s26_s17 = ssub.s32 %s3137_s21, %s3291_s16  ;;  %p36_p6 = scmp.ne.s32.totalorder %s3133_s20, %s3129_s19 }
  0x40   : > { %p27_p13 = scmp.eq.s32.totalorder %s26_s17, 0  ;;  %p37_p10 = scmp.eq.s32.totalorder %s3137_s21, 0 }
  0x41   : > { %p3718_p5 = scmp.eq.s32.totalorder %s3202_s22, 1  ;;  %p2727_p9 = scmp.lt.s32.totalorder %s3137_s21, 2 }
  0x42   : > { %s3300_s27 = scalar_select %p27_p13, %s3133_s20, %s29_s23  }
  0x43   : > { %p38_p3 = por %p37_p10, %p36_p6  ;;  %p3304_p7 = por %p3718_p5, %p36_p6 }
  0x44   : > { %s208_s29 = sand.u32 1, %s3133_s20   ;;  %s2297_s6 = sshll.u32 %s3137_s21, 13 }
  0x45   : > { %s3719_s30 = scalar_select %p3304_p7, 1, 0 }
  0x46   : > { %s2105_s7 = sshll.u32 %s208_s29, 9  ;;  %s3314_s10 = scalar_lea.hbm %s3705_s0, %s2297_s6 }
  0x47   : > { %s212_s11 = scalar_lea.vmem [#allocation2], %s2105_s7  ;;  %p3318_p11 = pnand %p2727_p9, %p38_p3 }
  0x48   : > { %s220_s28 = sshll.u32 %s212_s11, 4  ;;  %s3322_s13 = scalar_lea.sflag [#allocation3], %s208_s29  ;;  %s3316_s28 = int_to_ptr.vmem [resolvable:$true] %s220_s28 }
  0x49   : > { %s3037_s14 = scalar_lea.hbm %s3314_s10, 8192  ;;  %p3039_p0 = pneg %p3318_p11 }
  0x4a   : > { %p3038_p12 = scmp.ne.s32.totalorder %s3314_s10, %s3037_s14  ;;  %s3042_s23 = scalar_lea.hbm %s3705_s0, 16384 }
  0x4b   : > { %p3043_p13 = scmp.lt.u32.totalorder %s3314_s10, %s3705_s0  ;;  %p3044_p6 = scmp.lt.u32.totalorder %s3042_s23, %s3037_s14 }
  0x4c   : > { %p3040_p2 = pnand %p3039_p0, %p3038_p12  ;;  %p3046_p3 = scmp.lt.u32.totalorder %s3037_s14, %s3314_s10 }
  0x4d   : > { %p3045_p10 = por %p3044_p6, %p3043_p13 }
  0x4e   : > { %p3041_p1 = pneg %p3040_p2 }
  0x4f   : > { %p3047_p5 = por %p3046_p3, %p3045_p10 }
  0x51   : > { %p3048_p9 = pnand %p3047_p5, %p3041_p1 }
  0x53   : > { %3051 = shalt.err (!%p3048_p9)
}
  0x54   : > { %s3052_s29 = scalar_lea.vmem %s3316_s28, 8192  ;;  %s3145_s8 = smov [#allocation2]  }
  0x55   : > { %p3053_p12 = scmp.ne.s32.totalorder %s3316_s28, %s3052_s29  ;;  %s3057_s9 = sshll.u32 %s3145_s8, 4  ;;  %s3058_s9 = int_to_ptr.vmem [resolvable:$false] %s3057_s9 }
  0x56   : > { %s3059_s11 = scalar_lea.vmem %s3058_s9, 16384  ;;  %p3060_p4 = scmp.lt.s32.totalorder %s3316_s28, %s3058_s9 }
  0x57   : > { %p3055_p2 = pnand %p3053_p12, %p3039_p0  ;;  %p3061_p13 = scmp.lt.s32.totalorder %s3059_s11, %s3052_s29 }
  0x59   : > { %p3056_p7 = pneg %p3055_p2  ;;  %p3062_p6 = por %p3061_p13, %p3060_p4 }
  0x5b   : > { %p3063_p10 = pnand %p3062_p6, %p3056_p7 }
  0x5d   : > { %3066 = shalt.err (!%p3063_p10)
}
  0x5e   : > { %s3146_s14 = smov 256   ;;  %s3147_s15 = smov 16  }
  0x5f   : > { %2720 = dma.hbm_to_vmem [thread:$0]  (!%p3318_p11), %s3314_s10, 8192, %s3316_s28, %s3322_s13, %s3146_s14, %s3146_s14, %s3147_s15  }
  0x60   : > { %232 = sbr.rel (%p3221_p8) target bundleno = 814 (0x32e), region = 40  ;;  %s3353_s17 = sand.u32 (!%p3221_p8), 1, %s3129_s19  }
  0x61   : > { %s2110_s23 = sshll.u32 (!%p3221_p8), %s3353_s17, 9  ;;  %s235_s7 = scalar_lea.sflag (!%p3221_p8), [#allocation3], %s3353_s17 }
  0x62   : > { %s3357_s6 = scalar_lea.vmem (!%p3221_p8), [#allocation2], %s2110_s23  ;;  %p3721_p4 = scmp.ne.s32.totalorder (!%p3221_p8), %s3714_s24, 0 }
  0x67   : > { %3112 = dma.done.wait (%p3721_p4), %s235_s7, 8192  }
  0x68   : > { %3114 = vsyncadd (%p3721_p4), %s235_s7, 4294959104  ;;  %p3722_p7 = scmp.eq.s32.totalorder %s3202_s22, 0 }
  0x6a   : > { %3116 = dma.done.wait (%p3722_p7), [#allocation6], 10240   ;;  %p3723_p8 = pmov %p3722_p7 }
  0x6b   : > { %v2773_v0 = vld [vmem:[#allocation5 + $0x4] ss:$8 sps:$4 sm:$0xff]   ;;  %v2775_v1 = vld [vmem:[#allocation5] ss:$8 sps:$4 sm:$0xff]   ;;  %v2776_v2 = vld [vmem:[#allocation5 + $0x14] ss:$8 sps:$4 sm:$0xff]  }
  0x6c   : > { %3118 = vsyncadd (%p3723_p8), [#allocation6], 4294957056  ;;  %1056 = vmatprep.subr.bf16.mxu0 %v2773_v0  ;;  %2538 = vmatprep.subr.bf16.mxu1 %v2773_v0  ;;  %v2778_v3 = vld [vmem:[#allocation5 + $0x10] ss:$8 sps:$4 sm:$0xff]   ;;  %v2779_v4 = vld [vmem:[#allocation5 + $0x24] ss:$8 sps:$4 sm:$0xff]  }
  0x6d   : > { %1057 = vmatpush1.bf16.msra.mxu0 %v2775_v1  ;;  %2554 = vmatpush1.bf16.msra.mxu1 %v2775_v1  ;;  %v2781_v5 = vld [vmem:[#allocation5 + $0x20] ss:$8 sps:$4 sm:$0xff]   ;;  %v2782_v6 = vld [vmem:[#allocation5 + $0x34] ss:$8 sps:$4 sm:$0xff]   ;;  %v2784_v7 = vld [vmem:[#allocation5 + $0x30] ss:$8 sps:$4 sm:$0xff]  }
  0x6e   : > { %1058 = vmatprep.subr.bf16.mxu0 %v2776_v2  ;;  %2539 = vmatprep.subr.bf16.mxu1 %v2776_v2  ;;  %v2785_v8 = vld [vmem:[#allocation5 + $0x44] ss:$8 sps:$4 sm:$0xff]   ;;  %v2787_v9 = vld [vmem:[#allocation5 + $0x40] ss:$8 sps:$4 sm:$0xff]   ;;  %v2788_v10 = vld [vmem:[#allocation5 + $0x54] ss:$8 sps:$4 sm:$0xff]  }
  0x6f   : > { %v2790_v11 = vld [vmem:[#allocation5 + $0x50] ss:$8 sps:$4 sm:$0xff]   ;;  %v2791_v12 = vld [vmem:[#allocation5 + $0x64] ss:$8 sps:$4 sm:$0xff]   ;;  %v2793_v14 = vld [vmem:[#allocation5 + $0x60] ss:$8 sps:$4 sm:$0xff]  }
  0x70   : > { %v2823_v13 = vld [vmem:[%s3357_s6 + $0x4] ss:$16 sps:$4 sm:$0xff]   ;;  %v2796_v16 = vld [vmem:[#allocation5 + $0x70] ss:$8 sps:$4 sm:$0xff]   ;;  %v2799_v18 = vld [vmem:[#allocation5 + $0x80] ss:$8 sps:$4 sm:$0xff]  }
  0x71   : > { %1059 = vmatpush1.bf16.msra.mxu0 %v2778_v3  ;;  %2555 = vmatpush1.bf16.msra.mxu1 %v2778_v3  ;;  %v2794_v15 = vld [vmem:[#allocation5 + $0x74] ss:$8 sps:$4 sm:$0xff]   ;;  %v2797_v17 = vld [vmem:[#allocation5 + $0x84] ss:$8 sps:$4 sm:$0xff]   ;;  %v2802_v20 = vld [vmem:[#allocation5 + $0x90] ss:$8 sps:$4 sm:$0xff]  }
  0x72   : > { %1060 = vmatprep.subr.bf16.mxu0 %v2779_v4  ;;  %2540 = vmatprep.subr.bf16.mxu1 %v2779_v4  ;;  %v2800_v19 = vld [vmem:[#allocation5 + $0x94] ss:$8 sps:$4 sm:$0xff]   ;;  %v2803_v21 = vld [vmem:[#allocation5 + $0xa4] ss:$8 sps:$4 sm:$0xff]   ;;  %v2805_v22 = vld [vmem:[#allocation5 + $0xa0] ss:$8 sps:$4 sm:$0xff]  }
  0x73   : > { %1088 = vmatprep.mubr.bf16.mxu0 %v2823_v13  ;;  %v2806_v23 = vld [vmem:[#allocation5 + $0xb4] ss:$8 sps:$4 sm:$0xff]   ;;  %v2808_v24 = vld [vmem:[#allocation5 + $0xb0] ss:$8 sps:$4 sm:$0xff]   ;;  %v2809_v25 = vld [vmem:[#allocation5 + $0xc4] ss:$8 sps:$4 sm:$0xff]  }
  0x74   : > { %v2811_v26 = vld [vmem:[#allocation5 + $0xc0] ss:$8 sps:$4 sm:$0xff]   ;;  %v2812_v27 = vld [vmem:[#allocation5 + $0xd4] ss:$8 sps:$4 sm:$0xff]   ;;  %v2814_v28 = vld [vmem:[#allocation5 + $0xd0] ss:$8 sps:$4 sm:$0xff]  }
  0x75   : > { %1061 = vmatpush1.bf16.msra.mxu0 %v2781_v5  ;;  %2556 = vmatpush1.bf16.msra.mxu1 %v2781_v5  ;;  %v2815_v29 = vld [vmem:[#allocation5 + $0xe4] ss:$8 sps:$4 sm:$0xff]   ;;  %v2817_v30 = vld [vmem:[#allocation5 + $0xe0] ss:$8 sps:$4 sm:$0xff]   ;;  %v2818_v31 = vld [vmem:[#allocation5 + $0xf4] ss:$8 sps:$4 sm:$0xff]  }
  0x76   : > { %1062 = vmatprep.subr.bf16.mxu0 %v2782_v6  ;;  %2541 = vmatprep.subr.bf16.mxu1 %v2782_v6  ;;  %v2820_v32 = vld [vmem:[#allocation5 + $0xf0] ss:$8 sps:$4 sm:$0xff]   ;;  %v2826_v33 = vld [vmem:[#allocation5 + $0x104] ss:$8 sps:$4 sm:$0xff]   ;;  %v2824_v35 = vld [vmem:[#allocation5 + $0x100] ss:$8 sps:$4 sm:$0xff]  }
  0x77   : > { %v2821_v34 = vld [vmem:[%s3357_s6] ss:$16 sps:$4 sm:$0xff]   ;;  %v2829_v36 = vld [vmem:[#allocation5 + $0x114] ss:$8 sps:$4 sm:$0xff]   ;;  %v2835_v43 = vld [vmem:[#allocation5 + $0x124] ss:$8 sps:$4 sm:$0xff]  }
  0x78   : > { %v2830_v37 = vld [vmem:[%s3357_s6 + $0x24] ss:$16 sps:$4 sm:$0xff]   ;;  %v2917_v38 = vld [vmem:[%s3357_s6 + $0x100] ss:$16 sps:$4 sm:$0xff]   ;;  %s2113_s12 = sshll.u32 %s3353_s17, 7  ;;  %s2330_s29 = sshll.u32 %s3202_s22, 11 }
  0x79   : > { %1063 = vmatpush1.bf16.msra.mxu0 %v2784_v7  ;;  %2557 = vmatpush1.bf16.msra.mxu1 %v2784_v7  ;;  %v2919_v39 = vld [vmem:[%s3357_s6 + $0x104] ss:$16 sps:$4 sm:$0xff]   ;;  %v2827_v40 = vld [vmem:[#allocation5 + $0x110] ss:$8 sps:$4 sm:$0xff]   ;;  %v2833_v44 = vld [vmem:[#allocation5 + $0x120] ss:$8 sps:$4 sm:$0xff]   ;;  %s3658_s14 = scalar_lea.hbm %s3710_s5, %s2330_s29 }
  0x7a   : > { %1064 = vmatprep.subr.bf16.mxu0 %v2785_v8  ;;  %2542 = vmatprep.subr.bf16.mxu1 %v2785_v8  ;;  %v2923_v41 = vld [vmem:[%s3357_s6 + $0x124] ss:$16 sps:$4 sm:$0xff]   ;;  %v2832_v42 = vld [vmem:[%s3357_s6 + $0x20] ss:$16 sps:$4 sm:$0xff]   ;;  %s3606_s13 = scalar_lea.vmem [#allocation8], %s2113_s12  ;;  %s1995_s15 = scalar_lea.sflag [#allocation4], %s3353_s17 }
  0x7b   : > { %1168 = vmatprep.mubr.bf16.mxu1 %v2919_v39  ;;  %v2839_v45 = vld [vmem:[%s3357_s6 + $0x44] ss:$16 sps:$4 sm:$0xff]   ;;  %v2925_v47 = vld [vmem:[%s3357_s6 + $0x120] ss:$16 sps:$4 sm:$0xff]   ;;  %s2008_s8 = sshll.u32 %s3606_s13, 4  ;;  %p3724_p0 = scmp.ne.s32.totalorder %s3719_s30, 0  ;;  %s3660_s8 = int_to_ptr.vmem [resolvable:$true] %s2008_s8 }
  0x7c   : > { %v2838_v46 = vld [vmem:[#allocation5 + $0x134] ss:$8 sps:$4 sm:$0xff]   ;;  %v2836_v48 = vld [vmem:[#allocation5 + $0x130] ss:$8 sps:$4 sm:$0xff]   ;;  %v2844_v50 = vld [vmem:[#allocation5 + $0x144] ss:$8 sps:$4 sm:$0xff]  }
  0x7d   : > { %1065 = vmatpush1.bf16.msra.mxu0 %v2787_v9  ;;  %2558 = vmatpush1.bf16.msra.mxu1 %v2787_v9  ;;  %v2929_v49 = vld [vmem:[%s3357_s6 + $0x144] ss:$16 sps:$4 sm:$0xff]   ;;  %v2841_v51 = vld [vmem:[%s3357_s6 + $0x40] ss:$16 sps:$4 sm:$0xff]   ;;  %s3067_s23 = scalar_lea.vmem %s3660_s8, 2048  ;;  %s3148_s22 = smov [#allocation8]  }
  0x7e   : > { %1066 = vmatprep.subr.bf16.mxu0 %v2788_v10  ;;  %2543 = vmatprep.subr.bf16.mxu1 %v2788_v10  ;;  %v2842_v52 = vld [vmem:[#allocation5 + $0x140] ss:$8 sps:$4 sm:$0xff]   ;;  %v2848_v53 = vld [vmem:[%s3357_s6 + $0x64] ss:$16 sps:$4 sm:$0xff]   ;;  %v2845_v56 = vld [vmem:[#allocation5 + $0x150] ss:$8 sps:$4 sm:$0xff]   ;;  %p3068_p11 = scmp.ne.s32.totalorder %s3660_s8, %s3067_s23 }
  0x7f   : > { %v2847_v54 = vld [vmem:[#allocation5 + $0x154] ss:$8 sps:$4 sm:$0xff]   ;;  %v2931_v55 = vld [vmem:[%s3357_s6 + $0x140] ss:$16 sps:$4 sm:$0xff]   ;;  %v2853_v58 = vld [vmem:[#allocation5 + $0x164] ss:$8 sps:$4 sm:$0xff]  }
  0x80   : > { %v2935_v57 = vld [vmem:[%s3357_s6 + $0x164] ss:$16 sps:$4 sm:$0xff]   ;;  %v2850_v59 = vld [vmem:[%s3357_s6 + $0x60] ss:$16 sps:$4 sm:$0xff]   ;;  %p3069_p1 = pnand %p3068_p11, %p3724_p0  ;;  %s3071_s7 = sshll.u32 %s3148_s22, 4  ;;  %s3072_s7 = int_to_ptr.vmem [resolvable:$false] %s3071_s7 }
  0x81   : > { %1067 = vmatpush1.bf16.msra.mxu0 %v2790_v11  ;;  %2559 = vmatpush1.bf16.msra.mxu1 %v2790_v11  ;;  %v2851_v60 = vld [vmem:[#allocation5 + $0x160] ss:$8 sps:$4 sm:$0xff]   ;;  %v2857_v61 = vld [vmem:[%s3357_s6 + $0x84] ss:$16 sps:$4 sm:$0xff]   ;;  %v2854_v1 = vld [vmem:[#allocation5 + $0x170] ss:$8 sps:$4 sm:$0xff]   ;;  %p3074_p5 = scmp.lt.s32.totalorder %s3660_s8, %s3072_s7 }
  0x82   : > { %1068 = vmatprep.subr.bf16.mxu0 %v2791_v12  ;;  %2544 = vmatprep.subr.bf16.mxu1 %v2791_v12  ;;  %v2856_v62 = vld [vmem:[#allocation5 + $0x174] ss:$8 sps:$4 sm:$0xff]   ;;  %v2937_v63 = vld [vmem:[%s3357_s6 + $0x160] ss:$16 sps:$4 sm:$0xff]   ;;  %v2862_v2 = vld [vmem:[#allocation5 + $0x184] ss:$8 sps:$4 sm:$0xff]   ;;  %p3070_p3 = pneg %p3069_p1 }
  0x83   : > { %v2941_v0 = vld [vmem:[%s3357_s6 + $0x184] ss:$16 sps:$4 sm:$0xff]   ;;  %v2859_v3 = vld [vmem:[%s3357_s6 + $0x80] ss:$16 sps:$4 sm:$0xff]  }
  0x84   : > { %v2860_v4 = vld [vmem:[#allocation5 + $0x180] ss:$8 sps:$4 sm:$0xff]   ;;  %v2866_v5 = vld [vmem:[%s3357_s6 + $0xa4] ss:$16 sps:$4 sm:$0xff]   ;;  %v2863_v9 = vld [vmem:[#allocation5 + $0x190] ss:$8 sps:$4 sm:$0xff]  }
  0x85   : > { %1069 = vmatpush1.bf16.msra.mxu0 %v2793_v14  ;;  %2560 = vmatpush1.bf16.msra.mxu1 %v2793_v14  ;;  %v2865_v6 = vld [vmem:[#allocation5 + $0x194] ss:$8 sps:$4 sm:$0xff]   ;;  %v2943_v7 = vld [vmem:[%s3357_s6 + $0x180] ss:$16 sps:$4 sm:$0xff]   ;;  %v2871_v10 = vld [vmem:[#allocation5 + $0x1a4] ss:$8 sps:$4 sm:$0xff]  }
  0x86   : > { %1070 = vmatprep.subr.bf16.mxu0 %v2794_v15  ;;  %2545 = vmatprep.subr.bf16.mxu1 %v2794_v15  ;;  %v2947_v8 = vld [vmem:[%s3357_s6 + $0x1a4] ss:$16 sps:$4 sm:$0xff]   ;;  %v2868_v11 = vld [vmem:[%s3357_s6 + $0xa0] ss:$16 sps:$4 sm:$0xff]  }
  0x87   : > { %v2869_v12 = vld [vmem:[#allocation5 + $0x1a0] ss:$8 sps:$4 sm:$0xff]   ;;  %v2875_v13 = vld [vmem:[%s3357_s6 + $0xc4] ss:$16 sps:$4 sm:$0xff]  }
  0x88   : > { %v2874_v14 = vld [vmem:[#allocation5 + $0x1b4] ss:$8 sps:$4 sm:$0xff]   ;;  %v2949_v15 = vld [vmem:[%s3357_s6 + $0x1a0] ss:$16 sps:$4 sm:$0xff]  }
  0x89   : > { %1071 = vmatpush1.bf16.msra.mxu0 %v2796_v16  ;;  %2561 = vmatpush1.bf16.msra.mxu1 %v2796_v16  ;;  %v2953_v16 = vld [vmem:[%s3357_s6 + $0x1c4] ss:$16 sps:$4 sm:$0xff]  }
  0x8a   : > { %1072 = vmatprep.subr.bf16.mxu0 %v2797_v17  ;;  %2546 = vmatprep.subr.bf16.mxu1 %v2797_v17  ;;  %v2872_v17 = vld [vmem:[#allocation5 + $0x1b0] ss:$8 sps:$4 sm:$0xff]  }
  0x8b   : > { %v2969_v39 = vld [vmem:[#allocation7 + $0x50] sm:$0xff]  }
  0x8d   : > { %1073 = vmatpush1.bf16.msra.mxu0 %v2799_v18  ;;  %2562 = vmatpush1.bf16.msra.mxu1 %v2799_v18  ;;  %v2880_v18 = vld [vmem:[#allocation5 + $0x1c4] ss:$8 sps:$4 sm:$0xff]  }
  0x8e   : > { %1074 = vmatprep.subr.bf16.mxu0 %v2800_v19  ;;  %2547 = vmatprep.subr.bf16.mxu1 %v2800_v19  ;;  %v2877_v19 = vld [vmem:[%s3357_s6 + $0xc0] ss:$16 sps:$4 sm:$0xff]  }
  0x91   : > { %1075 = vmatpush1.bf16.msra.mxu0 %v2802_v20  ;;  %2563 = vmatpush1.bf16.msra.mxu1 %v2802_v20  ;;  %v2878_v20 = vld [vmem:[#allocation5 + $0x1c0] ss:$8 sps:$4 sm:$0xff]  }
  0x92   : > { %1076 = vmatprep.subr.bf16.mxu0 %v2803_v21  ;;  %2548 = vmatprep.subr.bf16.mxu1 %v2803_v21  ;;  %v2884_v21 = vld [vmem:[%s3357_s6 + $0xe4] ss:$16 sps:$4 sm:$0xff]  }
  0x95   : > { %1077 = vmatpush1.bf16.msra.mxu0 %v2805_v22  ;;  %2564 = vmatpush1.bf16.msra.mxu1 %v2805_v22  ;;  %v2883_v22 = vld [vmem:[#allocation5 + $0x1d4] ss:$8 sps:$4 sm:$0xff]  }
  0x96   : > { %1078 = vmatprep.subr.bf16.mxu0 %v2806_v23  ;;  %2549 = vmatprep.subr.bf16.mxu1 %v2806_v23  ;;  %v2955_v23 = vld [vmem:[%s3357_s6 + $0x1c0] ss:$16 sps:$4 sm:$0xff]  }
  0x99   : > { %1079 = vmatpush1.bf16.msra.mxu0 %v2808_v24  ;;  %2565 = vmatpush1.bf16.msra.mxu1 %v2808_v24  ;;  %v2959_v24 = vld [vmem:[%s3357_s6 + $0x1e4] ss:$16 sps:$4 sm:$0xff]  }
  0x9a   : > { %1080 = vmatprep.subr.bf16.mxu0 %v2809_v25  ;;  %2550 = vmatprep.subr.bf16.mxu1 %v2809_v25  ;;  %v2881_v25 = vld [vmem:[#allocation5 + $0x1d0] ss:$8 sps:$4 sm:$0xff]  }
  0x9d   : > { %1081 = vmatpush1.bf16.msra.mxu0 %v2811_v26  ;;  %2566 = vmatpush1.bf16.msra.mxu1 %v2811_v26  ;;  %v2889_v26 = vld [vmem:[#allocation5 + $0x1e4] ss:$8 sps:$4 sm:$0xff]  }
  0x9e   : > { %1082 = vmatprep.subr.bf16.mxu0 %v2812_v27  ;;  %2551 = vmatprep.subr.bf16.mxu1 %v2812_v27  ;;  %v2886_v27 = vld [vmem:[%s3357_s6 + $0xe0] ss:$16 sps:$4 sm:$0xff]  }
  0xa1   : > { %1083 = vmatpush1.bf16.msra.mxu0 %v2814_v28  ;;  %2567 = vmatpush1.bf16.msra.mxu1 %v2814_v28  ;;  %v2887_v28 = vld [vmem:[#allocation5 + $0x1e0] ss:$8 sps:$4 sm:$0xff]  }
  0xa2   : > { %1084 = vmatprep.subr.bf16.mxu0 %v2815_v29  ;;  %2552 = vmatprep.subr.bf16.mxu1 %v2815_v29  ;;  %v2895_v29 = vld [vmem:[%s3357_s6 + $0xc] ss:$16 sps:$4 sm:$0xff]  }
  0xa5   : > { %1085 = vmatpush1.bf16.msra.mxu0 %v2817_v30  ;;  %2568 = vmatpush1.bf16.msra.mxu1 %v2817_v30  ;;  %v2892_v30 = vld [vmem:[#allocation5 + $0x1f4] ss:$8 sps:$4 sm:$0xff]  }
  0xa6   : > { %1086 = vmatprep.subr.bf16.mxu0 %v2818_v31  ;;  %2553 = vmatprep.subr.bf16.mxu1 %v2818_v31  ;;  %v2961_v31 = vld [vmem:[%s3357_s6 + $0x1e0] ss:$16 sps:$4 sm:$0xff]  }
  0xa9   : > { %1087 = vmatpush1.bf16.msra.mxu0 %v2820_v32  ;;  %2569 = vmatpush1.bf16.msra.mxu1 %v2820_v32  ;;  %v2965_v32 = vld [vmem:[#allocation7 + $0x40] sm:$0xff]  }
  0xaa   : > { %1249 = vmatprep.subr.bf16.mxu0 %v2826_v33  ;;  %v2966_v33 = vld [vmem:[#allocation7] sm:$0xff]   ;;  %2426 = vmatprep.subr.bf16.mxu1 %v2965_v32 }
  0xac   : > { %1089 = vmatmul.mubr.bf16.vlgmr.msra.gmra.mrb[0].mxu0 %v2821_v34  ;;  %1169 = vmatmul.mubr.bf16.vlgmr.msra.gmra.mrb[0].mxu1 %v2917_v38  ;;  %v2890_v34 = vld [vmem:[#allocation5 + $0x1f0] ss:$8 sps:$4 sm:$0xff]   ;;  %v2896_v38 = vld [vmem:[%s3357_s6 + $0x2c] ss:$16 sps:$4 sm:$0xff]  }
  0xad   : > { %1250 = vmatpush1.bf16.msra.mxu0 %v2824_v35  ;;  %1098 = vmatprep.mubr.bf16.mxu0 %v2830_v37  ;;  %v2967_v35 = vld [vmem:[#allocation7 + $0x48] sm:$0xff]  }
  0xae   : > { %1251 = vmatprep.subr.bf16.mxu0 %v2829_v36  ;;  %1178 = vmatprep.mubr.bf16.mxu1 %v2923_v41  ;;  %v2893_v36 = vld [vmem:[%s3357_s6 + $0x8] ss:$16 sps:$4 sm:$0xff]  }
  0xaf   : > { %2427 = vmatpush3.bf16.msra.mxu1 %v2966_v33  ;;  %v2968_v37 = vld [vmem:[#allocation7 + $0x8] sm:$0xff]   ;;  %v2971_v41 = vld [vmem:[#allocation7 + $0x58] sm:$0xff]  }
  0xb0   : > { %2428 = vmatprep.subr.bf16.mxu1 %v2967_v35 }
  0xb1   : > { %1252 = vmatpush1.bf16.msra.mxu0 %v2827_v40  ;;  %v2970_v40 = vld [vmem:[#allocation7 + $0x10] sm:$0xff]  }
  0xb2   : > { %1253 = vmatprep.subr.bf16.mxu0 %v2835_v43  ;;  %v2972_v43 = vld [vmem:[#allocation7 + $0x18] sm:$0xff]  }
  0xb3   : > { %2429 = vmatpush3.bf16.msra.mxu1 %v2968_v37 }
  0xb4   : > { %1099 = vmatmul.mubr.bf16.gmra.mrb[4].mxu0 %v2832_v42  ;;  %1179 = vmatmul.mubr.bf16.gmra.mrb[4].mxu1 %v2925_v47  ;;  %v2898_v42 = vld [vmem:[%s3357_s6 + $0x28] ss:$16 sps:$4 sm:$0xff]  }
  0xb5   : > { %1254 = vmatpush1.bf16.msra.mxu0 %v2833_v44  ;;  %1108 = vmatprep.mubr.bf16.mxu0 %v2839_v45  ;;  %v2899_v44 = vld [vmem:[%s3357_s6 + $0x4c] ss:$16 sps:$4 sm:$0xff]   ;;  %v2973_v45 = vld [vmem:[#allocation7 + $0x60] sm:$0xff]  }
  0xb6   : > { %1255 = vmatprep.subr.bf16.mxu0 %v2838_v46  ;;  %1188 = vmatprep.mubr.bf16.mxu1 %v2929_v49  ;;  %v2974_v46 = vld [vmem:[#allocation7 + $0x20] sm:$0xff]   ;;  %v2975_v47 = vld [vmem:[#allocation7 + $0x68] sm:$0xff]  }
  0xb7   : > { %2430 = vmatprep.subr.bf16.mxu1 %v2969_v39  ;;  %v2976_v49 = vld [vmem:[#allocation7 + $0x28] sm:$0xff]  }
  0xb8   : > { %2431 = vmatpush3.bf16.msra.mxu1 %v2970_v40  ;;  %v406_v40 = vlaneseq }
  0xb9   : > { %1256 = vmatpush1.bf16.msra.mxu0 %v2836_v48  ;;  %2432 = vmatprep.subr.bf16.mxu1 %v2971_v41  ;;  %v2901_v48 = vld [vmem:[%s3357_s6 + $0x48] ss:$16 sps:$4 sm:$0xff]  }
  0xba   : > { %1257 = vmatprep.subr.bf16.mxu0 %v2844_v50  ;;  %v2902_v50 = vld [vmem:[%s3357_s6 + $0x6c] ss:$16 sps:$4 sm:$0xff]  }
  0xbc   : > { %1109 = vmatmul.mubr.bf16.gmra.mrb[8].mxu0 %v2841_v51  ;;  %1189 = vmatmul.mubr.bf16.gmra.mrb[8].mxu1 %v2931_v55  ;;  %v2977_v51 = vld [vmem:[#allocation7 + $0x70] sm:$0xff]   ;;  %v2907_v55 = vld [vmem:[%s3357_s6 + $0x88] ss:$16 sps:$4 sm:$0xff]  }
  0xbd   : > { %1258 = vmatpush1.bf16.msra.mxu0 %v2842_v52  ;;  %1118 = vmatprep.mubr.bf16.mxu0 %v2848_v53  ;;  %v2978_v52 = vld [vmem:[#allocation7 + $0x30] sm:$0xff]   ;;  %v2904_v53 = vld [vmem:[%s3357_s6 + $0x68] ss:$16 sps:$4 sm:$0xff]  }
  0xbe   : > { %1259 = vmatprep.subr.bf16.mxu0 %v2847_v54  ;;  %1198 = vmatprep.mubr.bf16.mxu1 %v2935_v57  ;;  %v2905_v54 = vld [vmem:[%s3357_s6 + $0x8c] ss:$16 sps:$4 sm:$0xff]   ;;  %v2910_v57 = vld [vmem:[%s3357_s6 + $0xa8] ss:$16 sps:$4 sm:$0xff]  }
  0xbf   : > { %2433 = vmatpush3.bf16.msra.mxu1 %v2972_v43  ;;  %v407_v43 = vshrl.u32 %v406_v40, 7 }
  0xc0   : > { %2434 = vmatprep.subr.bf16.mxu1 %v2973_v45 }
  0xc1   : > { %1260 = vmatpush1.bf16.msra.mxu0 %v2845_v56  ;;  %v2908_v56 = vld [vmem:[%s3357_s6 + $0xac] ss:$16 sps:$4 sm:$0xff]  }
  0xc2   : > { %1261 = vmatprep.subr.bf16.mxu0 %v2853_v58  ;;  %v2911_v58 = vld [vmem:[%s3357_s6 + $0xcc] ss:$16 sps:$4 sm:$0xff]  }
  0xc3   : > { %2435 = vmatpush3.bf16.msra.mxu1 %v2974_v46  ;;  %v408_v46 = vsub.s32 0, %v407_v43 }
  0xc4   : > { %1119 = vmatmul.mubr.bf16.gmra.mrb[12].mxu0 %v2850_v59  ;;  %1199 = vmatmul.mubr.bf16.gmra.mrb[12].mxu1 %v2937_v63  ;;  %v2913_v59 = vld [vmem:[%s3357_s6 + $0xc8] ss:$16 sps:$4 sm:$0xff]  }
  0xc5   : > { %1262 = vmatpush1.bf16.msra.mxu0 %v2851_v60  ;;  %1128 = vmatprep.mubr.bf16.mxu0 %v2857_v61  ;;  %v2914_v60 = vld [vmem:[%s3357_s6 + $0xec] ss:$16 sps:$4 sm:$0xff]   ;;  %v2916_v61 = vld [vmem:[%s3357_s6 + $0xe8] ss:$16 sps:$4 sm:$0xff]  }
  0xc6   : > { %1263 = vmatprep.subr.bf16.mxu0 %v2856_v62  ;;  %1208 = vmatprep.mubr.bf16.mxu1 %v2941_v0  ;;  %v2920_v62 = vld [vmem:[%s3357_s6 + $0x10c] ss:$16 sps:$4 sm:$0xff]   ;;  %v2922_v63 = vld [vmem:[%s3357_s6 + $0x108] ss:$16 sps:$4 sm:$0xff]  }
  0xc7   : > { %2436 = vmatprep.subr.bf16.mxu1 %v2975_v47  ;;  %v2926_v0 = vld [vmem:[%s3357_s6 + $0x12c] ss:$16 sps:$4 sm:$0xff]   ;;  %v404_v47 = vld [vmem:[%s3707_s2] sm:$0x3] }
  0xc8   : > { %2437 = vmatpush3.bf16.msra.mxu1 %v2976_v49 }
  0xc9   : > { %1264 = vmatpush1.bf16.msra.mxu0 %v2854_v1  ;;  %2438 = vmatprep.subr.bf16.mxu1 %v2977_v51  ;;  %v2928_v1 = vld [vmem:[%s3357_s6 + $0x128] ss:$16 sps:$4 sm:$0xff]   ;;  %v3494_v51 = vrot.slane %v404_v47, %v408_v46 }
  0xca   : > { %1265 = vmatprep.subr.bf16.mxu0 %v2862_v2  ;;  %v2932_v2 = vld [vmem:[%s3357_s6 + $0x14c] ss:$16 sps:$4 sm:$0xff]  }
  0xcc   : > { %1129 = vmatmul.mubr.bf16.gmra.mrb[16].mxu0 %v2859_v3  ;;  %1209 = vmatmul.mubr.bf16.gmra.mrb[16].mxu1 %v2943_v7  ;;  %v2934_v3 = vld [vmem:[%s3357_s6 + $0x148] ss:$16 sps:$4 sm:$0xff]  }
  0xcd   : > { %1266 = vmatpush1.bf16.msra.mxu0 %v2860_v4  ;;  %1138 = vmatprep.mubr.bf16.mxu0 %v2866_v5  ;;  %v2938_v4 = vld [vmem:[%s3357_s6 + $0x16c] ss:$16 sps:$4 sm:$0xff]   ;;  %v2940_v5 = vld [vmem:[%s3357_s6 + $0x168] ss:$16 sps:$4 sm:$0xff]  }
  0xce   : > { %1267 = vmatprep.subr.bf16.mxu0 %v2865_v6  ;;  %1218 = vmatprep.mubr.bf16.mxu1 %v2947_v8  ;;  %v2944_v6 = vld [vmem:[%s3357_s6 + $0x18c] ss:$16 sps:$4 sm:$0xff]  }
  0xcf   : > { %2439 = vmatpush3.bf16.msra.mxu1 %v2978_v52  ;;  %v2979_v7 = vld [vmem:[#allocation7 + $0x78] sm:$0xff]  }
  0xd0   : > { %v2980_v8 = vld [vmem:[#allocation7 + $0x38] sm:$0xff]   ;;  %2440 = vmatprep.subr.bf16.mxu1 %v2979_v7 }
  0xd1   : > { %1268 = vmatpush1.bf16.msra.mxu0 %v2863_v9  ;;  %v2946_v9 = vld [vmem:[%s3357_s6 + $0x188] ss:$16 sps:$4 sm:$0xff]  }
  0xd2   : > { %1269 = vmatprep.subr.bf16.mxu0 %v2871_v10  ;;  %v2950_v10 = vld [vmem:[%s3357_s6 + $0x1ac] ss:$16 sps:$4 sm:$0xff]  }
  0xd3   : > { %2441 = vmatpush3.bf16.msra.mxu1 %v2980_v8 }
  0xd4   : > { %1139 = vmatmul.mubr.bf16.gmra.mrb[20].mxu0 %v2868_v11  ;;  %1219 = vmatmul.mubr.bf16.gmra.mrb[20].mxu1 %v2949_v15  ;;  %v2952_v11 = vld [vmem:[%s3357_s6 + $0x1a8] ss:$16 sps:$4 sm:$0xff]  }
  0xd5   : > { %1270 = vmatpush1.bf16.msra.mxu0 %v2869_v12  ;;  %1148 = vmatprep.mubr.bf16.mxu0 %v2875_v13  ;;  %v2956_v12 = vld [vmem:[%s3357_s6 + $0x1cc] ss:$16 sps:$4 sm:$0xff]   ;;  %v2958_v13 = vld [vmem:[%s3357_s6 + $0x1c8] ss:$16 sps:$4 sm:$0xff]  }
  0xd6   : > { %1271 = vmatprep.subr.bf16.mxu0 %v2874_v14  ;;  %1228 = vmatprep.mubr.bf16.mxu1 %v2953_v16  ;;  %v2962_v14 = vld [vmem:[%s3357_s6 + $0x1ec] ss:$16 sps:$4 sm:$0xff]   ;;  %v2964_v15 = vld [vmem:[%s3357_s6 + $0x1e8] ss:$16 sps:$4 sm:$0xff]   ;;  %s3073_s6 = scalar_lea.vmem %s3072_s7, 4096 }
  0xd7   : > { %p3075_p9 = scmp.lt.s32.totalorder %s3073_s6, %s3067_s23 }
  0xd9   : > { %1272 = vmatpush1.bf16.msra.mxu0 %v2872_v17  ;;  %p3076_p12 = por %p3075_p9, %p3074_p5 }
  0xda   : > { %1273 = vmatprep.subr.bf16.mxu0 %v2880_v18 }
  0xdb   : > { %p3077_p2 = pnand %p3076_p12, %p3070_p3 }
  0xdc   : > { %1149 = vmatmul.mubr.bf16.gmra.mrb[24].mxu0 %v2877_v19  ;;  %1229 = vmatmul.mubr.bf16.gmra.mrb[24].mxu1 %v2955_v23 }
  0xdd   : > { %1274 = vmatpush1.bf16.msra.mxu0 %v2878_v20  ;;  %1158 = vmatprep.mubr.bf16.mxu0 %v2884_v21 }
  0xde   : > { %1275 = vmatprep.subr.bf16.mxu0 %v2883_v22  ;;  %1238 = vmatprep.mubr.bf16.mxu1 %v2959_v24 }
  0xe1   : > { %1276 = vmatpush1.bf16.msra.mxu0 %v2881_v25 }
  0xe2   : > { %1277 = vmatprep.subr.bf16.mxu0 %v2889_v26 }
  0xe4   : > { %1159 = vmatmul.mubr.bf16.gmra.mrb[28].mxu0 %v2886_v27  ;;  %1239 = vmatmul.mubr.bf16.gmra.mrb[28].mxu1 %v2961_v31 }
  0xe5   : > { %1278 = vmatpush1.bf16.msra.mxu0 %v2887_v28  ;;  %1281 = vmatprep.mubr.bf16.mxu0 %v2895_v29 }
  0xe6   : > { %1279 = vmatprep.subr.bf16.mxu0 %v2892_v30 }
  0xe9   : > { %1280 = vmatpush1.bf16.msra.mxu0 %v2890_v34 }
  0xec   : > { %1282 = vmatmul.mubr.bf16.vlgmr.msra.gmra.mrb[0].mxu0 %v2893_v36 }
  0xed   : > { %1291 = vmatprep.mubr.bf16.mxu0 %v2896_v38 }
  0xf4   : > { %1292 = vmatmul.mubr.bf16.gmra.mrb[4].mxu0 %v2898_v42 }
  0xf5   : > { %1301 = vmatprep.mubr.bf16.mxu0 %v2899_v44 }
  0xfc   : > { %1302 = vmatmul.mubr.bf16.gmra.mrb[8].mxu0 %v2901_v48  ;;  %v412_v48 = vsub.s32 1, %v407_v43 }
  0xfd   : > { %1311 = vmatprep.mubr.bf16.mxu0 %v2902_v50 }
 0x104   : > { %1312 = vmatmul.mubr.bf16.gmra.mrb[12].mxu0 %v2904_v53  ;;  %v3498_v53 = vrot.slane %v404_v47, %v412_v48 }
 0x105   : > { %1321 = vmatprep.mubr.bf16.mxu0 %v2905_v54 }
 0x10c   : > { %1322 = vmatmul.mubr.bf16.gmra.mrb[16].mxu0 %v2907_v55 }
 0x10d   : > { %1331 = vmatprep.mubr.bf16.mxu0 %v2908_v56 }
 0x114   : > { %1332 = vmatmul.mubr.bf16.gmra.mrb[20].mxu0 %v2910_v57 }
 0x115   : > { %1341 = vmatprep.mubr.bf16.mxu0 %v2911_v58 }
 0x11c   : > { %1342 = vmatmul.mubr.bf16.gmra.mrb[24].mxu0 %v2913_v59 }
 0x11d   : > { %1351 = vmatprep.mubr.bf16.mxu0 %v2914_v60 }
 0x124   : > { %1352 = vmatmul.mubr.bf16.gmra.mrb[28].mxu0 %v2916_v61 }
 0x125   : > { %1361 = vmatprep.mubr.bf16.mxu0 %v2920_v62 }
 0x12c   : > { %1362 = vmatmul.mubr.bf16.gmra.mrb[32].mxu0 %v2922_v63 }
 0x12d   : > { %1371 = vmatprep.mubr.bf16.mxu0 %v2926_v0 }
 0x134   : > { %1372 = vmatmul.mubr.bf16.gmra.mrb[36].mxu0 %v2928_v1 }
 0x135   : > { %1381 = vmatprep.mubr.bf16.mxu0 %v2932_v2 }
 0x13c   : > { %1382 = vmatmul.mubr.bf16.gmra.mrb[40].mxu0 %v2934_v3 }
 0x13d   : > { %1391 = vmatprep.mubr.bf16.mxu0 %v2938_v4 }
 0x144   : > { %1392 = vmatmul.mubr.bf16.gmra.mrb[44].mxu0 %v2940_v5 }
 0x145   : > { %1401 = vmatprep.mubr.bf16.mxu0 %v2944_v6 }
 0x14c   : > { %1402 = vmatmul.mubr.bf16.gmra.mrb[48].mxu0 %v2946_v9 }
 0x14d   : > { %1411 = vmatprep.mubr.bf16.mxu0 %v2950_v10 }
 0x154   : > { %1412 = vmatmul.mubr.bf16.gmra.mrb[52].mxu0 %v2952_v11 }
 0x155   : > { %1421 = vmatprep.mubr.bf16.mxu0 %v2956_v12 }
 0x15c   : > { %1422 = vmatmul.mubr.bf16.gmra.mrb[56].mxu0 %v2958_v13 }
 0x15d   : > { %1431 = vmatprep.mubr.bf16.mxu0 %v2962_v14 }
 0x164   : > { %1432 = vmatmul.mubr.bf16.gmra.mrb[60].mxu0 %v2964_v15 }
 0x17f   : > { %v3431_v16 = vpop.f32.mrb[0].mxu1 }
 0x180   : > { %v3433_v17 = vpop.f32.mrb[1].mxu1 }
 0x181   : > { %v3435_v18 = vpop.f32.mrb[2].mxu1 }
 0x182   : > { %v3437_v19 = vpop.f32.mrb[3].mxu1 }
 0x187   : > { %v3439_v20 = vpop.f32.mrb[4].mxu1 }
 0x188   : > { %v3441_v21 = vpop.f32.mrb[5].mxu1 }
 0x189   : > { %v3443_v22 = vpop.f32.mrb[6].mxu1 }
 0x18a   : > { %v3445_v23 = vpop.f32.mrb[7].mxu1 }
 0x18f   : > { %v3447_v24 = vpop.f32.mrb[8].mxu1 }
 0x190   : > { %v3449_v25 = vpop.f32.mrb[9].mxu1 }
 0x191   : > { %v3451_v26 = vpop.f32.mrb[10].mxu1 }
 0x192   : > { %v3453_v27 = vpop.f32.mrb[11].mxu1 }
 0x197   : > { %v3455_v28 = vpop.f32.mrb[12].mxu1 }
 0x198   : > { %v3457_v29 = vpop.f32.mrb[13].mxu1 }
 0x199   : > { %v3459_v30 = vpop.f32.mrb[14].mxu1 }
 0x19a   : > { %v3461_v31 = vpop.f32.mrb[15].mxu1 }
 0x19f   : > { %v3463_v32 = vpop.f32.mrb[16].mxu1 }
 0x1a0   : > { %v3465_v33 = vpop.f32.mrb[17].mxu1 }
 0x1a1   : > { %v3467_v34 = vpop.f32.mrb[18].mxu1 }
 0x1a2   : > { %v3469_v35 = vpop.f32.mrb[19].mxu1 }
 0x1a7   : > { %v3471_v36 = vpop.f32.mrb[20].mxu1 }
 0x1a8   : > { %v3473_v37 = vpop.f32.mrb[21].mxu1 }
 0x1a9   : > { %v3475_v38 = vpop.f32.mrb[22].mxu1 }
 0x1aa   : > { %v3477_v39 = vpop.f32.mrb[23].mxu1 }
 0x1af   : > { %v3479_v41 = vpop.f32.mrb[24].mxu1 }
 0x1b0   : > { %v3481_v42 = vpop.f32.mrb[25].mxu1 }
 0x1b1   : > { %v3483_v44 = vpop.f32.mrb[26].mxu1 }
 0x1b2   : > { %v3485_v45 = vpop.f32.mrb[27].mxu1 }
 0x1b7   : > { %v3490_v49 = vpop.f32.mrb[28].mxu1 }
 0x1b8   : > { %v3492_v50 = vpop.f32.mrb[29].mxu1 }
 0x1b9   : > { %v3496_v52 = vpop.f32.mrb[30].mxu1 }
 0x1ba   : > { %v3500_v54 = vpop.f32.mrb[31].mxu1 }
 0x1bf   : > { %v1283_v55 = vpop.f32.mrb[0].mxu0 }
 0x1c0   : > { %v2570_v56 = vadd.f32 %v1283_v55, %v3494_v51  ;;  %v1285_v57 = vpop.f32.mrb[1].mxu0 }
 0x1c1   : > { %v2571_v58 = vadd.f32 %v1285_v57, %v3498_v53  ;;  %v1287_v59 = vpop.f32.mrb[2].mxu0 }
 0x1c2   : > { %v2572_v60 = vadd.f32 %v1287_v59, %v3494_v51  ;;  %v1289_v61 = vpop.f32.mrb[3].mxu0  ;;  %v1442_v63 = vmax.f32 %v2570_v56, 0.0 }
 0x1c3   : > { %v2573_v62 = vadd.f32 %v1289_v61, %v3498_v53  ;;  %v1443_v1 = vmax.f32 %v2571_v58, 0.0 }
 0x1c4   : > { %v1444_v0 = vmax.f32 %v2572_v60, 0.0 }
 0x1c5   : > { %v1445_v2 = vmax.f32 %v2573_v62, 0.0 }
 0x1c6   : > { %v1506_v3 = vpack.c.bf16 %v1444_v0, %v1442_v63 }
 0x1c7   : > { %v1507_v4 = vpack.c.bf16 %v1445_v2, %v1443_v1  ;;  %v1293_v5 = vpop.f32.mrb[4].mxu0 }
 0x1c8   : > { %v2574_v6 = vadd.f32 %v1293_v5, %v3494_v51  ;;  %v1295_v7 = vpop.f32.mrb[5].mxu0 }
 0x1c9   : > { %v2575_v8 = vadd.f32 %v1295_v7, %v3498_v53  ;;  %v1297_v9 = vpop.f32.mrb[6].mxu0  ;;  %1705 = vmatprep.mubr.bf16.mxu1 %v1507_v4 }
 0x1ca   : > { %v2576_v10 = vadd.f32 %v1297_v9, %v3494_v51  ;;  %v1299_v11 = vpop.f32.mrb[7].mxu0  ;;  %1706 = vmatmul.mubr.bf16.vlgmr.msra.gmra.mrb[32].mxu1 %v1506_v3  ;;  %v1446_v13 = vmax.f32 %v2574_v6, 0.0 }
 0x1cb   : > { %v2577_v12 = vadd.f32 %v1299_v11, %v3498_v53  ;;  %v1447_v15 = vmax.f32 %v2575_v8, 0.0 }
 0x1cc   : > { %v1448_v14 = vmax.f32 %v2576_v10, 0.0 }
 0x1cd   : > { %v1449_v40 = vmax.f32 %v2577_v12, 0.0 }
 0x1ce   : > { %v1508_v43 = vpack.c.bf16 %v1448_v14, %v1446_v13 }
 0x1cf   : > { %v1509_v46 = vpack.c.bf16 %v1449_v40, %v1447_v15  ;;  %v1303_v47 = vpop.f32.mrb[8].mxu0 }
 0x1d0   : > { %v2578_v48 = vadd.f32 %v1303_v47, %v3494_v51  ;;  %v1305_v55 = vpop.f32.mrb[9].mxu0 }
 0x1d1   : > { %v2579_v56 = vadd.f32 %v1305_v55, %v3498_v53  ;;  %v1307_v57 = vpop.f32.mrb[10].mxu0  ;;  %1713 = vmatprep.mubr.bf16.mxu1 %v1509_v46 }
 0x1d2   : > { %v2580_v58 = vadd.f32 %v1307_v57, %v3494_v51  ;;  %v1309_v59 = vpop.f32.mrb[11].mxu0  ;;  %1714 = vmatmul.mubr.bf16.gmra.mrb[36].mxu1 %v1508_v43  ;;  %v1450_v61 = vmax.f32 %v2578_v48, 0.0 }
 0x1d3   : > { %v2581_v60 = vadd.f32 %v1309_v59, %v3498_v53  ;;  %v1451_v63 = vmax.f32 %v2579_v56, 0.0 }
 0x1d4   : > { %v1452_v62 = vmax.f32 %v2580_v58, 0.0 }
 0x1d5   : > { %v1453_v0 = vmax.f32 %v2581_v60, 0.0 }
 0x1d6   : > { %v1510_v1 = vpack.c.bf16 %v1452_v62, %v1450_v61 }
 0x1d7   : > { %v1511_v2 = vpack.c.bf16 %v1453_v0, %v1451_v63  ;;  %v1313_v3 = vpop.f32.mrb[12].mxu0 }
 0x1d8   : > { %v2582_v4 = vadd.f32 %v1313_v3, %v3494_v51  ;;  %v1315_v5 = vpop.f32.mrb[13].mxu0 }
 0x1d9   : > { %v2583_v6 = vadd.f32 %v1315_v5, %v3498_v53  ;;  %v1317_v7 = vpop.f32.mrb[14].mxu0  ;;  %1721 = vmatprep.mubr.bf16.mxu1 %v1511_v2 }
 0x1da   : > { %v2584_v8 = vadd.f32 %v1317_v7, %v3494_v51  ;;  %v1319_v9 = vpop.f32.mrb[15].mxu0  ;;  %1722 = vmatmul.mubr.bf16.gmra.mrb[40].mxu1 %v1510_v1  ;;  %v1454_v11 = vmax.f32 %v2582_v4, 0.0 }
 0x1db   : > { %v2585_v10 = vadd.f32 %v1319_v9, %v3498_v53  ;;  %v1455_v13 = vmax.f32 %v2583_v6, 0.0 }
 0x1dc   : > { %v1456_v12 = vmax.f32 %v2584_v8, 0.0 }
 0x1dd   : > { %v1457_v14 = vmax.f32 %v2585_v10, 0.0 }
 0x1de   : > { %v1512_v15 = vpack.c.bf16 %v1456_v12, %v1454_v11 }
 0x1df   : > { %v1513_v40 = vpack.c.bf16 %v1457_v14, %v1455_v13  ;;  %v1323_v43 = vpop.f32.mrb[16].mxu0 }
 0x1e0   : > { %v2586_v46 = vadd.f32 %v1323_v43, %v3494_v51  ;;  %v1325_v47 = vpop.f32.mrb[17].mxu0 }
 0x1e1   : > { %v2587_v48 = vadd.f32 %v1325_v47, %v3498_v53  ;;  %v1327_v55 = vpop.f32.mrb[18].mxu0  ;;  %1729 = vmatprep.mubr.bf16.mxu1 %v1513_v40 }
 0x1e2   : > { %v2588_v56 = vadd.f32 %v1327_v55, %v3494_v51  ;;  %v1329_v57 = vpop.f32.mrb[19].mxu0  ;;  %1730 = vmatmul.mubr.bf16.gmra.mrb[44].mxu1 %v1512_v15  ;;  %v1458_v59 = vmax.f32 %v2586_v46, 0.0 }
 0x1e3   : > { %v2589_v58 = vadd.f32 %v1329_v57, %v3498_v53  ;;  %v1459_v61 = vmax.f32 %v2587_v48, 0.0 }
 0x1e4   : > { %v1460_v60 = vmax.f32 %v2588_v56, 0.0 }
 0x1e5   : > { %v1461_v62 = vmax.f32 %v2589_v58, 0.0 }
 0x1e6   : > { %v1514_v63 = vpack.c.bf16 %v1460_v60, %v1458_v59 }
 0x1e7   : > { %v1515_v0 = vpack.c.bf16 %v1461_v62, %v1459_v61  ;;  %v1333_v1 = vpop.f32.mrb[20].mxu0 }
 0x1e8   : > { %v2590_v2 = vadd.f32 %v1333_v1, %v3494_v51  ;;  %v1335_v3 = vpop.f32.mrb[21].mxu0 }
 0x1e9   : > { %v2591_v4 = vadd.f32 %v1335_v3, %v3498_v53  ;;  %v1337_v5 = vpop.f32.mrb[22].mxu0  ;;  %1737 = vmatprep.mubr.bf16.mxu1 %v1515_v0 }
 0x1ea   : > { %v2592_v6 = vadd.f32 %v1337_v5, %v3494_v51  ;;  %v1339_v7 = vpop.f32.mrb[23].mxu0  ;;  %1738 = vmatmul.mubr.bf16.gmra.mrb[48].mxu1 %v1514_v63  ;;  %v1462_v9 = vmax.f32 %v2590_v2, 0.0 }
 0x1eb   : > { %v2593_v8 = vadd.f32 %v1339_v7, %v3498_v53  ;;  %v1463_v11 = vmax.f32 %v2591_v4, 0.0 }
 0x1ec   : > { %v1464_v10 = vmax.f32 %v2592_v6, 0.0 }
 0x1ed   : > { %v1465_v12 = vmax.f32 %v2593_v8, 0.0 }
 0x1ee   : > { %v1516_v13 = vpack.c.bf16 %v1464_v10, %v1462_v9  ;;  %v1171_v9 = vadd.f32 %v3431_v16, %v3494_v51 }
 0x1ef   : > { %v1517_v14 = vpack.c.bf16 %v1465_v12, %v1463_v11  ;;  %v1343_v15 = vpop.f32.mrb[24].mxu0  ;;  %v1173_v12 = vadd.f32 %v3433_v17, %v3498_v53 }
 0x1f0   : > { %v2594_v40 = vadd.f32 %v1343_v15, %v3494_v51  ;;  %v1345_v43 = vpop.f32.mrb[25].mxu0 }
 0x1f1   : > { %v2595_v46 = vadd.f32 %v1345_v43, %v3498_v53  ;;  %v1347_v47 = vpop.f32.mrb[26].mxu0  ;;  %1745 = vmatprep.mubr.bf16.mxu1 %v1517_v14 }
 0x1f2   : > { %v2596_v48 = vadd.f32 %v1347_v47, %v3494_v51  ;;  %v1349_v55 = vpop.f32.mrb[27].mxu0  ;;  %1746 = vmatmul.mubr.bf16.gmra.mrb[52].mxu1 %v1516_v13  ;;  %v1466_v57 = vmax.f32 %v2594_v40, 0.0  ;;  %v1175_v40 = vadd.f32 %v3435_v18, %v3494_v51  ;;  %v1177_v47 = vadd.f32 %v3437_v19, %v3498_v53 }
 0x1f3   : > { %v2597_v56 = vadd.f32 %v1349_v55, %v3498_v53  ;;  %v1467_v59 = vmax.f32 %v2595_v46, 0.0  ;;  %v1183_v18 = vadd.f32 %v3441_v21, %v3498_v53 }
 0x1f4   : > { %v1468_v58 = vmax.f32 %v2596_v48, 0.0 }
 0x1f5   : > { %v1469_v60 = vmax.f32 %v2597_v56, 0.0 }
 0x1f6   : > { %v1518_v61 = vpack.c.bf16 %v1468_v58, %v1466_v57 }
 0x1f7   : > { %v1519_v62 = vpack.c.bf16 %v1469_v60, %v1467_v59  ;;  %v1353_v63 = vpop.f32.mrb[28].mxu0  ;;  %v1181_v59 = vadd.f32 %v3439_v20, %v3494_v51 }
 0x1f8   : > { %v2598_v0 = vadd.f32 %v1353_v63, %v3494_v51  ;;  %v1355_v1 = vpop.f32.mrb[29].mxu0 }
 0x1f9   : > { %v2599_v2 = vadd.f32 %v1355_v1, %v3498_v53  ;;  %v1357_v3 = vpop.f32.mrb[30].mxu0  ;;  %1753 = vmatprep.mubr.bf16.mxu1 %v1519_v62 }
 0x1fa   : > { %v2600_v4 = vadd.f32 %v1357_v3, %v3494_v51  ;;  %v1359_v5 = vpop.f32.mrb[31].mxu0  ;;  %1754 = vmatmul.mubr.bf16.gmra.mrb[56].mxu1 %v1518_v61  ;;  %v1470_v7 = vmax.f32 %v2598_v0, 0.0  ;;  %v1185_v0 = vadd.f32 %v3443_v22, %v3494_v51  ;;  %v1187_v3 = vadd.f32 %v3445_v23, %v3498_v53 }
 0x1fb   : > { %v2601_v6 = vadd.f32 %v1359_v5, %v3498_v53  ;;  %v1471_v10 = vmax.f32 %v2599_v2, 0.0  ;;  %v1193_v22 = vadd.f32 %v3449_v25, %v3498_v53 }
 0x1fc   : > { %v1472_v8 = vmax.f32 %v2600_v4, 0.0 }
 0x1fd   : > { %v1473_v11 = vmax.f32 %v2601_v6, 0.0 }
 0x1fe   : > { %v1520_v13 = vpack.c.bf16 %v1472_v8, %v1470_v7 }
 0x1ff   : > { %v1521_v14 = vpack.c.bf16 %v1473_v11, %v1471_v10  ;;  %v1363_v15 = vpop.f32.mrb[32].mxu0 }
 0x200   : > { %v1364_v43 = vadd.f32 %v1363_v15, %v1171_v9  ;;  %v1365_v46 = vpop.f32.mrb[33].mxu0  ;;  %v1191_v9 = vadd.f32 %v3447_v24, %v3494_v51 }
 0x201   : > { %v1366_v48 = vadd.f32 %v1365_v46, %v1173_v12  ;;  %v1367_v55 = vpop.f32.mrb[34].mxu0  ;;  %1761 = vmatprep.mubr.bf16.mxu1 %v1521_v14  ;;  %v1195_v14 = vadd.f32 %v3451_v26, %v3494_v51  ;;  %v1203_v26 = vadd.f32 %v3457_v29, %v3498_v53 }
 0x202   : > { %v1368_v16 = vadd.f32 %v1367_v55, %v1175_v40  ;;  %v1369_v56 = vpop.f32.mrb[35].mxu0  ;;  %1762 = vmatmul.mubr.bf16.gmra.mrb[60].mxu1 %v1520_v13  ;;  %v1474_v58 = vmax.f32 %v1364_v43, 0.0  ;;  %v1197_v43 = vadd.f32 %v3453_v27, %v3498_v53 }
 0x203   : > { %v1370_v57 = vadd.f32 %v1369_v56, %v1177_v47  ;;  %v1475_v60 = vmax.f32 %v1366_v48, 0.0  ;;  %v1201_v56 = vadd.f32 %v3455_v28, %v3494_v51 }
 0x204   : > { %v1476_v17 = vmax.f32 %v1368_v16, 0.0 }
 0x205   : > { %v1477_v61 = vmax.f32 %v1370_v57, 0.0 }
 0x206   : > { %v1522_v62 = vpack.c.bf16 %v1476_v17, %v1474_v58 }
 0x207   : > { %v1523_v63 = vpack.c.bf16 %v1477_v61, %v1475_v60  ;;  %v1373_v19 = vpop.f32.mrb[36].mxu0  ;;  %v1205_v60 = vadd.f32 %v3459_v30, %v3494_v51  ;;  %v1213_v30 = vadd.f32 %v3465_v33, %v3498_v53 }
 0x208   : > { %v1374_v1 = vadd.f32 %v1373_v19, %v1181_v59  ;;  %v1375_v2 = vpop.f32.mrb[37].mxu0 }
 0x209   : > { %v1376_v4 = vadd.f32 %v1375_v2, %v1183_v18  ;;  %v1377_v5 = vpop.f32.mrb[38].mxu0  ;;  %1769 = vmatprep.mubr.bf16.mxu1 %v1523_v63 }
 0x20a   : > { %v1378_v20 = vadd.f32 %v1377_v5, %v1185_v0  ;;  %v1379_v6 = vpop.f32.mrb[39].mxu0  ;;  %1770 = vmatmul.mubr.bf16.gmra.mrb[64].mxu1 %v1522_v62  ;;  %v1478_v8 = vmax.f32 %v1374_v1, 0.0  ;;  %v1207_v62 = vadd.f32 %v3461_v31, %v3498_v53 }
 0x20b   : > { %v1380_v7 = vadd.f32 %v1379_v6, %v1187_v3  ;;  %v1479_v10 = vmax.f32 %v1376_v4, 0.0  ;;  %v1211_v3 = vadd.f32 %v3463_v32, %v3494_v51 }
 0x20c   : > { %v1480_v21 = vmax.f32 %v1378_v20, 0.0 }
 0x20d   : > { %v1481_v11 = vmax.f32 %v1380_v7, 0.0  ;;  %v1215_v7 = vadd.f32 %v3467_v34, %v3494_v51  ;;  %v1223_v34 = vadd.f32 %v3473_v37, %v3498_v53 }
 0x20e   : > { %v1524_v12 = vpack.c.bf16 %v1480_v21, %v1478_v8 }
 0x20f   : > { %v1525_v13 = vpack.c.bf16 %v1481_v11, %v1479_v10  ;;  %v1383_v23 = vpop.f32.mrb[40].mxu0 }
 0x210   : > { %v1384_v15 = vadd.f32 %v1383_v23, %v1191_v9  ;;  %v1385_v40 = vpop.f32.mrb[41].mxu0  ;;  %v1217_v9 = vadd.f32 %v3469_v35, %v3498_v53  ;;  %v1221_v23 = vadd.f32 %v3471_v36, %v3494_v51 }
 0x211   : > { %v1386_v46 = vadd.f32 %v1385_v40, %v1193_v22  ;;  %v1387_v47 = vpop.f32.mrb[42].mxu0  ;;  %1777 = vmatprep.mubr.bf16.mxu1 %v1525_v13 }
 0x212   : > { %v1388_v24 = vadd.f32 %v1387_v47, %v1195_v14  ;;  %v1389_v48 = vpop.f32.mrb[43].mxu0  ;;  %1778 = vmatmul.mubr.bf16.gmra.mrb[68].mxu1 %v1524_v12  ;;  %v1482_v16 = vmax.f32 %v1384_v15, 0.0 }
 0x213   : > { %v1390_v55 = vadd.f32 %v1389_v48, %v1197_v43  ;;  %v1483_v57 = vmax.f32 %v1386_v46, 0.0  ;;  %v1225_v46 = vadd.f32 %v3475_v38, %v3494_v51  ;;  %v1227_v48 = vadd.f32 %v3477_v39, %v3498_v53 }
 0x214   : > { %v1484_v25 = vmax.f32 %v1388_v24, 0.0  ;;  %v1233_v38 = vadd.f32 %v3481_v42, %v3498_v53 }
 0x215   : > { %v1485_v58 = vmax.f32 %v1390_v55, 0.0 }
 0x216   : > { %v1526_v17 = vpack.c.bf16 %v1484_v25, %v1482_v16 }
 0x217   : > { %v1527_v59 = vpack.c.bf16 %v1485_v58, %v1483_v57  ;;  %v1393_v27 = vpop.f32.mrb[44].mxu0  ;;  %v1231_v58 = vadd.f32 %v3479_v41, %v3494_v51 }
 0x218   : > { %v1394_v61 = vadd.f32 %v1393_v27, %v1201_v56  ;;  %v1395_v18 = vpop.f32.mrb[45].mxu0 }
 0x219   : > { %v1396_v63 = vadd.f32 %v1395_v18, %v1203_v26  ;;  %v1397_v19 = vpop.f32.mrb[46].mxu0  ;;  %1785 = vmatprep.mubr.bf16.mxu1 %v1527_v59 }
 0x21a   : > { %v1398_v28 = vadd.f32 %v1397_v19, %v1205_v60  ;;  %v1399_v0 = vpop.f32.mrb[47].mxu0  ;;  %1786 = vmatmul.mubr.bf16.gmra.mrb[72].mxu1 %v1526_v17  ;;  %v1486_v2 = vmax.f32 %v1394_v61, 0.0  ;;  %v1235_v60 = vadd.f32 %v3483_v44, %v3494_v51  ;;  %v1243_v44 = vadd.f32 %v3492_v50, %v3498_v53 }
 0x21b   : > { %v1400_v1 = vadd.f32 %v1399_v0, %v1207_v62  ;;  %v1487_v4 = vmax.f32 %v1396_v63, 0.0  ;;  %v1237_v62 = vadd.f32 %v3485_v45, %v3498_v53 }
 0x21c   : > { %v1488_v29 = vmax.f32 %v1398_v28, 0.0 }
 0x21d   : > { %v1489_v5 = vmax.f32 %v1400_v1, 0.0 }
 0x21e   : > { %v1528_v20 = vpack.c.bf16 %v1488_v29, %v1486_v2  ;;  %v1241_v2 = vadd.f32 %v3490_v49, %v3494_v51 }
 0x21f   : > { %v1529_v6 = vpack.c.bf16 %v1489_v5, %v1487_v4  ;;  %v1403_v31 = vpop.f32.mrb[48].mxu0 }
 0x220   : > { %v1404_v8 = vadd.f32 %v1403_v31, %v1211_v3  ;;  %v1405_v21 = vpop.f32.mrb[49].mxu0  ;;  %v1247_v31 = vadd.f32 %v3500_v54, %v3498_v53  ;;  %v3601_v54 = vld [vmem:[%s3709_s4] ss:$0 sm:$0xff] }
 0x221   : > { %v1406_v10 = vadd.f32 %v1405_v21, %v1213_v30  ;;  %v1407_v11 = vpop.f32.mrb[50].mxu0  ;;  %1793 = vmatprep.mubr.bf16.mxu1 %v1529_v6  ;;  %v1245_v30 = vadd.f32 %v3496_v52, %v3494_v51 }
 0x222   : > { %v1408_v32 = vadd.f32 %v1407_v11, %v1215_v7  ;;  %v1409_v22 = vpop.f32.mrb[51].mxu0  ;;  %1794 = vmatmul.mubr.bf16.gmra.mrb[76].mxu1 %v1528_v20  ;;  %v1490_v13 = vmax.f32 %v1404_v8, 0.0 }
 0x223   : > { %v1410_v12 = vadd.f32 %v1409_v22, %v1217_v9  ;;  %v1491_v14 = vmax.f32 %v1406_v10, 0.0 }
 0x224   : > { %v1492_v33 = vmax.f32 %v1408_v32, 0.0 }
 0x225   : > { %v1493_v15 = vmax.f32 %v1410_v12, 0.0 }
 0x226   : > { %v1530_v40 = vpack.c.bf16 %v1492_v33, %v1490_v13 }
 0x227   : > { %v1531_v43 = vpack.c.bf16 %v1493_v15, %v1491_v14  ;;  %v1413_v35 = vpop.f32.mrb[52].mxu0 }
 0x228   : > { %v1414_v47 = vadd.f32 %v1413_v35, %v1221_v23  ;;  %v1415_v24 = vpop.f32.mrb[53].mxu0 }
 0x229   : > { %v1416_v55 = vadd.f32 %v1415_v24, %v1223_v34  ;;  %v1417_v16 = vpop.f32.mrb[54].mxu0  ;;  %1801 = vmatprep.mubr.bf16.mxu1 %v1531_v43 }
 0x22a   : > { %v1418_v36 = vadd.f32 %v1417_v16, %v1225_v46  ;;  %v1419_v25 = vpop.f32.mrb[55].mxu0  ;;  %1802 = vmatmul.mubr.bf16.gmra.mrb[80].mxu1 %v1530_v40  ;;  %v1494_v57 = vmax.f32 %v1414_v47, 0.0 }
 0x22b   : > { %v1420_v56 = vadd.f32 %v1419_v25, %v1227_v48  ;;  %v1495_v26 = vmax.f32 %v1416_v55, 0.0 }
 0x22c   : > { %v1496_v37 = vmax.f32 %v1418_v36, 0.0 }
 0x22d   : > { %v1497_v17 = vmax.f32 %v1420_v56, 0.0 }
 0x22e   : > { %v1532_v59 = vpack.c.bf16 %v1496_v37, %v1494_v57 }
 0x22f   : > { %v1533_v27 = vpack.c.bf16 %v1497_v17, %v1495_v26  ;;  %v1423_v39 = vpop.f32.mrb[56].mxu0 }
 0x230   : > { %v1424_v61 = vadd.f32 %v1423_v39, %v1231_v58  ;;  %v1425_v18 = vpop.f32.mrb[57].mxu0 }
 0x231   : > { %v1426_v63 = vadd.f32 %v1425_v18, %v1233_v38  ;;  %v1427_v19 = vpop.f32.mrb[58].mxu0  ;;  %1809 = vmatprep.mubr.bf16.mxu1 %v1533_v27 }
 0x232   : > { %v1428_v41 = vadd.f32 %v1427_v19, %v1235_v60  ;;  %v1429_v28 = vpop.f32.mrb[59].mxu0  ;;  %1810 = vmatmul.mubr.bf16.gmra.mrb[84].mxu1 %v1532_v59  ;;  %v1498_v1 = vmax.f32 %v1424_v61, 0.0 }
 0x233   : > { %v1430_v0 = vadd.f32 %v1429_v28, %v1237_v62  ;;  %v1499_v29 = vmax.f32 %v1426_v63, 0.0 }
 0x234   : > { %v1500_v42 = vmax.f32 %v1428_v41, 0.0 }
 0x235   : > { %v1501_v3 = vmax.f32 %v1430_v0, 0.0 }
 0x236   : > { %v1534_v4 = vpack.c.bf16 %v1500_v42, %v1498_v1 }
 0x237   : > { %v1535_v5 = vpack.c.bf16 %v1501_v3, %v1499_v29  ;;  %v1433_v45 = vpop.f32.mrb[60].mxu0 }
 0x238   : > { %v1434_v20 = vadd.f32 %v1433_v45, %v1241_v2  ;;  %v1435_v6 = vpop.f32.mrb[61].mxu0 }
 0x239   : > { %v1436_v7 = vadd.f32 %v1435_v6, %v1243_v44  ;;  %v1437_v8 = vpop.f32.mrb[62].mxu0  ;;  %1817 = vmatprep.mubr.bf16.mxu1 %v1535_v5 }
 0x23a   : > { %v1438_v49 = vadd.f32 %v1437_v8, %v1245_v30  ;;  %v1439_v21 = vpop.f32.mrb[63].mxu0  ;;  %1818 = vmatmul.mubr.bf16.gmra.mrb[88].mxu1 %v1534_v4  ;;  %v1502_v50 = vmax.f32 %v1434_v20, 0.0 }
 0x23b   : > { %v1440_v9 = vadd.f32 %v1439_v21, %v1247_v31  ;;  %v1503_v11 = vmax.f32 %v1436_v7, 0.0 }
 0x23c   : > { %v1504_v10 = vmax.f32 %v1438_v49, 0.0 }
 0x23d   : > { %v1505_v32 = vmax.f32 %v1440_v9, 0.0 }
 0x23e   : > { %v1536_v22 = vpack.c.bf16 %v1504_v10, %v1502_v50 }
 0x23f   : > { %v1537_v12 = vpack.c.bf16 %v1505_v32, %v1503_v11 }
 0x241   : > { %1825 = vmatprep.mubr.bf16.mxu1 %v1537_v12 }
 0x242   : > { %1826 = vmatmul.mubr.bf16.gmra.mrb[92].mxu1 %v1536_v22 }
 0x29d   : > { %v2442_v51 = vpop.f32.mrb[32].mxu1 }
 0x29e   : > { %v2443_v52 = vpop.f32.mrb[33].mxu1 }
 0x29f   : > { %v2444_v13 = vadd.f32 %v2443_v52, %v2442_v51  ;;  %v2445_v53 = vpop.f32.mrb[34].mxu1 }
 0x2a0   : > { %v2446_v33 = vpop.f32.mrb[35].mxu1 }
 0x2a1   : > { %v2447_v23 = vadd.f32 %v2446_v33, %v2445_v53  ;;  %v1708_v14 = vadd.f32 %v2444_v13, %v3601_v54 }
 0x2a3   : > { %v1711_v15 = vadd.f32 %v2447_v23, %v3601_v54 }
 0x2a5   : > { %v2334_v34 = vpack.c.bf16 %v1711_v15, %v1708_v14  ;;  %v2448_v40 = vpop.f32.mrb[36].mxu1 }
 0x2a6   : > { %v2449_v43 = vpop.f32.mrb[37].mxu1 }
 0x2a7   : > { %2335 = vst [vmem:[%s3606_s13] sm:$0xff] %v2334_v34   ;;  %v2450_v35 = vadd.f32 %v2449_v43, %v2448_v40  ;;  %v2451_v46 = vpop.f32.mrb[38].mxu1 }
 0x2a8   : > { %v2452_v47 = vpop.f32.mrb[39].mxu1 }
 0x2a9   : > { %v2453_v24 = vadd.f32 %v2452_v47, %v2451_v46  ;;  %v1716_v48 = vadd.f32 %v2450_v35, %v3601_v54 }
 0x2ab   : > { %v1719_v55 = vadd.f32 %v2453_v24, %v3601_v54 }
 0x2ad   : > { %v2339_v16 = vpack.c.bf16 %v1719_v55, %v1716_v48  ;;  %v2454_v36 = vpop.f32.mrb[40].mxu1 }
 0x2ae   : > { %v2455_v25 = vpop.f32.mrb[41].mxu1 }
 0x2af   : > { %2411 = vst [vmem:[%s3606_s13 + $0x8] sm:$0xff] %v2339_v16   ;;  %v2456_v56 = vadd.f32 %v2455_v25, %v2454_v36  ;;  %v2457_v57 = vpop.f32.mrb[42].mxu1 }
 0x2b0   : > { %v2458_v37 = vpop.f32.mrb[43].mxu1 }
 0x2b1   : > { %v2459_v58 = vadd.f32 %v2458_v37, %v2457_v57  ;;  %v1724_v26 = vadd.f32 %v2456_v56, %v3601_v54 }
 0x2b3   : > { %v1727_v17 = vadd.f32 %v2459_v58, %v3601_v54 }
 0x2b5   : > { %v2344_v38 = vpack.c.bf16 %v1727_v17, %v1724_v26  ;;  %v2460_v59 = vpop.f32.mrb[44].mxu1 }
 0x2b6   : > { %v2461_v27 = vpop.f32.mrb[45].mxu1 }
 0x2b7   : > { %2412 = vst [vmem:[%s3606_s13 + $0x10] sm:$0xff] %v2344_v38   ;;  %v2462_v39 = vadd.f32 %v2461_v27, %v2460_v59  ;;  %v2463_v60 = vpop.f32.mrb[46].mxu1 }
 0x2b8   : > { %v2464_v61 = vpop.f32.mrb[47].mxu1 }
 0x2b9   : > { %v2465_v18 = vadd.f32 %v2464_v61, %v2463_v60  ;;  %v1732_v62 = vadd.f32 %v2462_v39, %v3601_v54 }
 0x2bb   : > { %v1735_v63 = vadd.f32 %v2465_v18, %v3601_v54 }
 0x2bd   : > { %v2349_v19 = vpack.c.bf16 %v1735_v63, %v1732_v62  ;;  %v2466_v41 = vpop.f32.mrb[48].mxu1 }
 0x2be   : > { %v2467_v28 = vpop.f32.mrb[49].mxu1 }
 0x2bf   : > { %2413 = vst [vmem:[%s3606_s13 + $0x18] sm:$0xff] %v2349_v19   ;;  %v2468_v0 = vadd.f32 %v2467_v28, %v2466_v41  ;;  %v2469_v1 = vpop.f32.mrb[50].mxu1 }
 0x2c0   : > { %v2470_v42 = vpop.f32.mrb[51].mxu1 }
 0x2c1   : > { %v2471_v2 = vadd.f32 %v2470_v42, %v2469_v1  ;;  %v1740_v29 = vadd.f32 %v2468_v0, %v3601_v54 }
 0x2c3   : > { %v1743_v3 = vadd.f32 %v2471_v2, %v3601_v54 }
 0x2c5   : > { %v2354_v44 = vpack.c.bf16 %v1743_v3, %v1740_v29  ;;  %v2472_v4 = vpop.f32.mrb[52].mxu1 }
 0x2c6   : > { %v2473_v5 = vpop.f32.mrb[53].mxu1 }
 0x2c7   : > { %2414 = vst [vmem:[%s3606_s13 + $0x20] sm:$0xff] %v2354_v44   ;;  %v2474_v45 = vadd.f32 %v2473_v5, %v2472_v4  ;;  %v2475_v30 = vpop.f32.mrb[54].mxu1 }
 0x2c8   : > { %v2476_v20 = vpop.f32.mrb[55].mxu1 }
 0x2c9   : > { %v2477_v6 = vadd.f32 %v2476_v20, %v2475_v30  ;;  %v1748_v31 = vadd.f32 %v2474_v45, %v3601_v54 }
 0x2cb   : > { %v1751_v7 = vadd.f32 %v2477_v6, %v3601_v54 }
 0x2cd   : > { %v2359_v8 = vpack.c.bf16 %v1751_v7, %v1748_v31  ;;  %v2478_v49 = vpop.f32.mrb[56].mxu1 }
 0x2ce   : > { %v2479_v21 = vpop.f32.mrb[57].mxu1 }
 0x2cf   : > { %2415 = vst [vmem:[%s3606_s13 + $0x28] sm:$0xff] %v2359_v8   ;;  %v2480_v9 = vadd.f32 %v2479_v21, %v2478_v49  ;;  %v2481_v50 = vpop.f32.mrb[58].mxu1 }
 0x2d0   : > { %v2482_v10 = vpop.f32.mrb[59].mxu1 }
 0x2d1   : > { %v2483_v11 = vadd.f32 %v2482_v10, %v2481_v50  ;;  %v1756_v32 = vadd.f32 %v2480_v9, %v3601_v54 }
 0x2d3   : > { %v1759_v22 = vadd.f32 %v2483_v11, %v3601_v54 }
 0x2d5   : > { %v2364_v12 = vpack.c.bf16 %v1759_v22, %v1756_v32  ;;  %v2484_v51 = vpop.f32.mrb[60].mxu1 }
 0x2d6   : > { %v2485_v52 = vpop.f32.mrb[61].mxu1 }
 0x2d7   : > { %2416 = vst [vmem:[%s3606_s13 + $0x30] sm:$0xff] %v2364_v12   ;;  %v2486_v13 = vadd.f32 %v2485_v52, %v2484_v51  ;;  %v2487_v53 = vpop.f32.mrb[62].mxu1 }
 0x2d8   : > { %v2488_v33 = vpop.f32.mrb[63].mxu1 }
 0x2d9   : > { %v2489_v23 = vadd.f32 %v2488_v33, %v2487_v53  ;;  %v1764_v14 = vadd.f32 %v2486_v13, %v3601_v54 }
 0x2db   : > { %v1767_v15 = vadd.f32 %v2489_v23, %v3601_v54 }
 0x2dd   : > { %v2369_v34 = vpack.c.bf16 %v1767_v15, %v1764_v14  ;;  %v2490_v40 = vpop.f32.mrb[64].mxu1 }
 0x2de   : > { %v2491_v43 = vpop.f32.mrb[65].mxu1 }
 0x2df   : > { %2417 = vst [vmem:[%s3606_s13 + $0x38] sm:$0xff] %v2369_v34   ;;  %v2492_v35 = vadd.f32 %v2491_v43, %v2490_v40  ;;  %v2493_v46 = vpop.f32.mrb[66].mxu1 }
 0x2e0   : > { %v2494_v47 = vpop.f32.mrb[67].mxu1 }
 0x2e1   : > { %v2495_v24 = vadd.f32 %v2494_v47, %v2493_v46  ;;  %v1772_v48 = vadd.f32 %v2492_v35, %v3601_v54 }
 0x2e3   : > { %v1775_v55 = vadd.f32 %v2495_v24, %v3601_v54 }
 0x2e5   : > { %v2374_v16 = vpack.c.bf16 %v1775_v55, %v1772_v48  ;;  %v2496_v36 = vpop.f32.mrb[68].mxu1 }
 0x2e6   : > { %v2497_v25 = vpop.f32.mrb[69].mxu1 }
 0x2e7   : > { %2418 = vst [vmem:[%s3606_s13 + $0x40] sm:$0xff] %v2374_v16   ;;  %v2498_v56 = vadd.f32 %v2497_v25, %v2496_v36  ;;  %v2499_v57 = vpop.f32.mrb[70].mxu1 }
 0x2e8   : > { %v2500_v37 = vpop.f32.mrb[71].mxu1 }
 0x2e9   : > { %v2501_v58 = vadd.f32 %v2500_v37, %v2499_v57  ;;  %v1780_v26 = vadd.f32 %v2498_v56, %v3601_v54 }
 0x2eb   : > { %v1783_v17 = vadd.f32 %v2501_v58, %v3601_v54 }
 0x2ed   : > { %v2379_v38 = vpack.c.bf16 %v1783_v17, %v1780_v26  ;;  %v2502_v59 = vpop.f32.mrb[72].mxu1 }
 0x2ee   : > { %v2503_v27 = vpop.f32.mrb[73].mxu1 }
 0x2ef   : > { %2419 = vst [vmem:[%s3606_s13 + $0x48] sm:$0xff] %v2379_v38   ;;  %v2504_v39 = vadd.f32 %v2503_v27, %v2502_v59  ;;  %v2505_v60 = vpop.f32.mrb[74].mxu1 }
 0x2f0   : > { %v2506_v61 = vpop.f32.mrb[75].mxu1 }
 0x2f1   : > { %v2507_v18 = vadd.f32 %v2506_v61, %v2505_v60  ;;  %v1788_v62 = vadd.f32 %v2504_v39, %v3601_v54 }
 0x2f3   : > { %v1791_v63 = vadd.f32 %v2507_v18, %v3601_v54 }
 0x2f5   : > { %v2384_v19 = vpack.c.bf16 %v1791_v63, %v1788_v62  ;;  %v2508_v41 = vpop.f32.mrb[76].mxu1 }
 0x2f6   : > { %v2509_v28 = vpop.f32.mrb[77].mxu1 }
 0x2f7   : > { %2420 = vst [vmem:[%s3606_s13 + $0x50] sm:$0xff] %v2384_v19   ;;  %v2510_v0 = vadd.f32 %v2509_v28, %v2508_v41  ;;  %v2511_v1 = vpop.f32.mrb[78].mxu1 }
 0x2f8   : > { %v2512_v42 = vpop.f32.mrb[79].mxu1 }
 0x2f9   : > { %v2513_v2 = vadd.f32 %v2512_v42, %v2511_v1  ;;  %v1796_v29 = vadd.f32 %v2510_v0, %v3601_v54 }
 0x2fb   : > { %v1799_v3 = vadd.f32 %v2513_v2, %v3601_v54 }
 0x2fd   : > { %v2389_v44 = vpack.c.bf16 %v1799_v3, %v1796_v29  ;;  %v2514_v4 = vpop.f32.mrb[80].mxu1 }
 0x2fe   : > { %v2515_v5 = vpop.f32.mrb[81].mxu1 }
 0x2ff   : > { %2421 = vst [vmem:[%s3606_s13 + $0x58] sm:$0xff] %v2389_v44   ;;  %v2516_v45 = vadd.f32 %v2515_v5, %v2514_v4  ;;  %v2517_v30 = vpop.f32.mrb[82].mxu1 }
 0x300   : > { %v2518_v20 = vpop.f32.mrb[83].mxu1 }
 0x301   : > { %v2519_v6 = vadd.f32 %v2518_v20, %v2517_v30  ;;  %v1804_v31 = vadd.f32 %v2516_v45, %v3601_v54 }
 0x303   : > { %v1807_v7 = vadd.f32 %v2519_v6, %v3601_v54 }
 0x305   : > { %v2394_v8 = vpack.c.bf16 %v1807_v7, %v1804_v31  ;;  %v2520_v49 = vpop.f32.mrb[84].mxu1 }
 0x306   : > { %v2521_v21 = vpop.f32.mrb[85].mxu1 }
 0x307   : > { %2422 = vst [vmem:[%s3606_s13 + $0x60] sm:$0xff] %v2394_v8   ;;  %v2522_v9 = vadd.f32 %v2521_v21, %v2520_v49  ;;  %v2523_v50 = vpop.f32.mrb[86].mxu1 }
 0x308   : > { %v2524_v10 = vpop.f32.mrb[87].mxu1 }
 0x309   : > { %v2525_v11 = vadd.f32 %v2524_v10, %v2523_v50  ;;  %v1812_v32 = vadd.f32 %v2522_v9, %v3601_v54 }
 0x30b   : > { %v1815_v22 = vadd.f32 %v2525_v11, %v3601_v54 }
 0x30d   : > { %v2399_v12 = vpack.c.bf16 %v1815_v22, %v1812_v32  ;;  %v2526_v51 = vpop.f32.mrb[88].mxu1 }
 0x30e   : > { %v2527_v52 = vpop.f32.mrb[89].mxu1 }
 0x30f   : > { %2423 = vst [vmem:[%s3606_s13 + $0x68] sm:$0xff] %v2399_v12   ;;  %v2528_v13 = vadd.f32 %v2527_v52, %v2526_v51  ;;  %v2529_v53 = vpop.f32.mrb[90].mxu1 }
 0x310   : > { %v2530_v33 = vpop.f32.mrb[91].mxu1 }
 0x311   : > { %v2531_v23 = vadd.f32 %v2530_v33, %v2529_v53  ;;  %v1820_v14 = vadd.f32 %v2528_v13, %v3601_v54 }
 0x313   : > { %v1823_v15 = vadd.f32 %v2531_v23, %v3601_v54 }
 0x315   : > { %v2404_v34 = vpack.c.bf16 %v1823_v15, %v1820_v14  ;;  %v2532_v40 = vpop.f32.mrb[92].mxu1 }
 0x316   : > { %v2533_v43 = vpop.f32.mrb[93].mxu1 }
 0x317   : > { %2424 = vst [vmem:[%s3606_s13 + $0x70] sm:$0xff] %v2404_v34   ;;  %v2534_v35 = vadd.f32 %v2533_v43, %v2532_v40  ;;  %v2535_v46 = vpop.f32.mrb[94].mxu1 }
 0x318   : > { %v2536_v47 = vpop.f32.mrb[95].mxu1 }
 0x319   : > { %v2537_v24 = vadd.f32 %v2536_v47, %v2535_v46  ;;  %v1828_v48 = vadd.f32 %v2534_v35, %v3601_v54 }
 0x31b   : > { %v1831_v55 = vadd.f32 %v2537_v24, %v3601_v54 }
 0x31d   : > { %v2409_v16 = vpack.c.bf16 %v1831_v55, %v1828_v48 }
 0x31f   : > { %2425 = vst [vmem:[%s3606_s13 + $0x78] sm:$0xff] %v2409_v16  }
 0x320   : > { %3080 = shalt.err (!%p3077_p2)
}
 0x321   : > { %s3081_s24 = scalar_lea.hbm %s3658_s14, 2048  ;;  %s3085_s28 = scalar_lea.hbm %s3710_s5, 4096 }
 0x322   : > { %p3082_p13 = scmp.ne.s32.totalorder %s3658_s14, %s3081_s24  ;;  %p3086_p4 = scmp.lt.u32.totalorder %s3658_s14, %s3710_s5 }
 0x323   : > { %p3087_p7 = scmp.lt.u32.totalorder %s3085_s28, %s3081_s24  ;;  %p3089_p11 = scmp.lt.u32.totalorder %s3081_s24, %s3658_s14 }
 0x324   : > { %p3083_p6 = pnand %p3082_p13, %p3724_p0 }
 0x325   : > { %p3088_p8 = por %p3087_p7, %p3086_p4 }
 0x326   : > { %p3084_p10 = pneg %p3083_p6 }
 0x327   : > { %p3090_p1 = por %p3089_p11, %p3088_p8 }
 0x329   : > { %p3091_p3 = pnand %p3090_p1, %p3084_p10 }
 0x32b   : > { %3094 = shalt.err (!%p3091_p3)
}
 0x32c   : > { %s3149_s29 = smov 64   ;;  %s3150_s9 = smov 4  }
 0x32d   : > { %2708 = dma.vmem_to_hbm [thread:$0]  (%p3724_p0), %s3660_s8, 2048, %s3658_s14, %s1995_s15, %s3149_s29, %s3149_s29, %s3150_s9  }
 0x32e PF: > { %s2023_s11 = sand.u32 1, %s3125_s18   ;;  %p3725_p5 = scmp.ne.s32.totalorder %s3715_s25, 0 }
 0x32f   : > { %p3726_p9 = scmp.ge.s32.totalorder %s3137_s21, 2  ;;  %s2024_s23 = scalar_lea.sflag [#allocation4], %s2023_s11 }
 0x331   : > { %p2722_p12 = pnand %p3726_p9, %p3725_p5 }
 0x333   : > { %3120 = dma.done.wait (!%p2722_p12), %s2024_s23, 2048  }
 0x334   : > { %3122 = vsyncadd (!%p2722_p12), %s2024_s23, 4294965248  ;;  %p19_p2 = scmp.ge.s32.totalorder %s3291_s16, 4   ;;  %s3727_s18 = smov %s3129_s19 }
 0x335   : > { %s3728_s19 = smov %s3133_s20  ;;  %s3729_s20 = smov %s3300_s27 }
 0x336   : > { %s3730_s21 = smov %s3291_s16  ;;  %21 = sbr.rel (!%p19_p2) target bundleno = 6 (0x6), region = 93 }
 0x33d   :  { %2029 = vsyncpa [#allocation3], 1 }
 0x33e   :  { %2031 = vsyncpa [#allocation3 + $0x1], 1 }
 0x33f   :  { %2032 = vsyncpa [#allocation6], 1 }
 0x340   :  { %2033 = vsyncpa [#allocation4], 1 }
 0x341   :  { %2035 = vsyncpa [#allocation4 + $0x1], 1 }

</bundles_post_ra>
